<compile_context>
chip_gen: v7x
topology: tpu7x:2x2x1
jax: 0.10.0
libtpu: 0.0.40
codegen_flags: <defaults>
</compile_context>

<pallas_src>
import jax
import jax.numpy as jnp
from jax import lax
from jax.experimental import pallas as pl
from jax.experimental.pallas import tpu as pltpu


def _round_up(x, m):
    return ((x + m - 1) // m) * m


def decoder_rnn_kernel(tok_ref, h0_ref, emb_ref, wx_ref, wh_ref, bi_ref,
                       bh_ref, wout_ref, bout_ref,
                       logp_ref, hout_ref,
                       x_ref, gi_ref, hall_ref):
    """Fused T-step decoder.

    tok_ref  : (T,)        int32, SMEM
    h0_ref   : (1, HP)     f32    initial hidden (lane-padded)
    emb_ref  : (V, HP)     f32    embedding table (lane-padded)
    wx_ref   : (HP, 3HP)   bf16   input-side gate weights  cols = [r | z | n]
    wh_ref   : (HP, 3HP)   bf16   hidden-side gate weights cols = [r | z | n]
    bi_ref   : (1, 3HP)    f32    [b_ir+b_hr | b_iz+b_hz | b_in]
    bh_ref   : (1, 3HP)    f32    [0 | 0 | b_hn]
    wout_ref : (HP, VP)    bf16   output projection
    bout_ref : (1, VP)     f32    output bias (-1e30 in padded vocab lanes)
    logp_ref : (T, VP)     f32    per-step log-probabilities (output)
    hout_ref : (1, HP)     f32    final hidden state (output)
    x_ref    : (T, HP)     f32    scratch: relu(embedding rows)
    gi_ref   : (T, 3HP)    f32    scratch: input-side gate pre-activations
    hall_ref : (T, HP)     f32    scratch: all hidden states
    """
    T = logp_ref.shape[0]
    HP = h0_ref.shape[1]

    # ---- Phase 1 (batched, off the recurrence critical path) --------------
    # Gather T embedding rows + relu into x_ref.
    def gather(t, carry):
        tok = tok_ref[t]
        x_ref[pl.ds(t, 1), :] = jnp.maximum(emb_ref[pl.ds(tok, 1), :], 0.0)
        return carry

    lax.fori_loop(0, T, gather, 0, unroll=True)

    # One batched MXU pass: gi_all = relu(X) @ W_x + b_i   -> (T, 3HP)
    gi_ref[...] = jnp.dot(x_ref[...].astype(jnp.bfloat16), wx_ref[...],
                          preferred_element_type=jnp.float32) + bi_ref[...]

    # ---- Phase 2: sequential GRU recurrence (per step only h @ W_h) -------
    w_h = wh_ref[...]
    b_h = bh_ref[...]

    def step(t, h):
        gh = jnp.dot(h.astype(jnp.bfloat16), w_h,
                     preferred_element_type=jnp.float32) + b_h        # (1, 3HP)
        gi = gi_ref[pl.ds(t, 1), :]                                   # (1, 3HP)
        r = jax.nn.sigmoid(gi[:, 0:HP] + gh[:, 0:HP])
        z = jax.nn.sigmoid(gi[:, HP:2 * HP] + gh[:, HP:2 * HP])
        n = jnp.tanh(gi[:, 2 * HP:3 * HP] + r * gh[:, 2 * HP:3 * HP])
        h_new = (1.0 - z) * n + z * h                                 # (1, HP) f32
        hall_ref[pl.ds(t, 1), :] = h_new
        return h_new

    h_final = lax.fori_loop(0, T, step, h0_ref[...], unroll=True)
    hout_ref[...] = h_final                                           # lane-dense store

    # ---- Phase 3: batched output projection + row-wise log-softmax --------
    # TODO(synk): tile this over a "parallel" vocab grid axis at realistic V.
    logits = jnp.dot(hall_ref[...].astype(jnp.bfloat16), wout_ref[...],
                     preferred_element_type=jnp.float32) + bout_ref[...]
    m = jnp.max(logits, axis=1, keepdims=True)
    lse = jnp.log(jnp.sum(jnp.exp(logits - m), axis=1, keepdims=True)) + m
    logp_ref[...] = logits - lse                       # single lane-dense (T, VP) store


def prepare_params(params):
    """One-time repack of PyTorch-layout params into kernel layout (hoisted
    out of the per-call path)."""
    V, H = params["emb"].shape
    HP = _round_up(H, 128)
    VP = _round_up(V, 128)

    wih_t = params["w_ih"].T.astype(jnp.float32)   # (H, 3H)  cols = [r | z | n]
    whh_t = params["w_hh"].T.astype(jnp.float32)   # (H, 3H)
    b_ih = params["b_ih"].astype(jnp.float32)
    b_hh = params["b_hh"].astype(jnp.float32)

    def pad_gates(w):
        # (H, 3H) -> (HP, 3HP): each gate block lives in its own 128-aligned span.
        out = jnp.zeros((HP, 3 * HP), jnp.float32)
        for g in range(3):
            out = out.at[0:H, g * HP:g * HP + H].set(w[:, g * H:(g + 1) * H])
        return out

    w_x = pad_gates(wih_t)
    w_h = pad_gates(whh_t)

    # Input-side bias: r/z get both halves pre-folded; n gets only b_in.
    b_i = jnp.zeros((1, 3 * HP), jnp.float32)
    b_i = b_i.at[0, 0:H].set(b_ih[0:H] + b_hh[0:H])
    b_i = b_i.at[0, HP:HP + H].set(b_ih[H:2 * H] + b_hh[H:2 * H])
    b_i = b_i.at[0, 2 * HP:2 * HP + H].set(b_ih[2 * H:3 * H])

    # Hidden-side bias: only b_hn (it sits inside r * (W_hn h + b_hn)).
    b_h = jnp.zeros((1, 3 * HP), jnp.float32)
    b_h = b_h.at[0, 2 * HP:2 * HP + H].set(b_hh[2 * H:3 * H])

    emb_p = jnp.zeros((V, HP), jnp.float32).at[:, :H].set(
        params["emb"].astype(jnp.float32))
    w_out_p = jnp.zeros((HP, VP), jnp.float32).at[:H, :V].set(
        params["w_out"].T.astype(jnp.float32))
    b_out_p = jnp.full((1, VP), -1e30, jnp.float32).at[0, :V].set(
        params["b_out"].astype(jnp.float32))

    return {
        "H": H, "V": V, "HP": HP, "VP": VP,
        "emb": emb_p,                              # f32 (relu on the VPU; TODO bf16+HBM gather at real V)
        "w_x": w_x.astype(jnp.bfloat16),           # bf16 MXU operands, f32 accum
        "w_h": w_h.astype(jnp.bfloat16),
        "b_i": b_i,
        "b_h": b_h,
        "w_out": w_out_p.astype(jnp.bfloat16),
        "b_out": b_out_p,
    }


def decoder_rnn_decode(tokens, hidden, prep):
    """Fused decode of T tokens (== T sequential applications of the module's
    forward with the hidden state chained).  tokens: (T,) int32, hidden: (1,1,H).
    Returns (log_probs (T, V), hidden (1, 1, H))."""
    H, V, HP, VP = prep["H"], prep["V"], prep["HP"], prep["VP"]
    T = int(tokens.shape[0])

    tokens = jnp.clip(jnp.asarray(tokens, dtype=jnp.int32), 0, V - 1)
    h_in = jnp.zeros((1, HP), jnp.float32).at[:, :H].set(
        hidden.reshape(1, H).astype(jnp.float32))

    vmem = pl.BlockSpec(memory_space=pltpu.MemorySpace.VMEM)
    smem = pl.BlockSpec(memory_space=pltpu.MemorySpace.SMEM)

    logp, h_out = pl.pallas_call(
        decoder_rnn_kernel,
        out_shape=(
            jax.ShapeDtypeStruct((T, VP), jnp.float32),
            jax.ShapeDtypeStruct((1, HP), jnp.float32),
        ),
        in_specs=[smem, vmem, vmem, vmem, vmem, vmem, vmem, vmem, vmem],
        out_specs=(vmem, vmem),
        scratch_shapes=[
            pltpu.VMEM((T, HP), jnp.float32),       # relu(embedding rows)
            pltpu.VMEM((T, 3 * HP), jnp.float32),   # gi_all
            pltpu.VMEM((T, HP), jnp.float32),       # all hidden states
        ],
    )(tokens, h_in, prep["emb"], prep["w_x"], prep["w_h"], prep["b_i"],
      prep["b_h"], prep["w_out"], prep["b_out"])

    return logp[:, :V], h_out[:, :H].reshape(1, 1, H)


def decoder_rnn_forward(token, hidden, prep):
    """Single-step interface matching the PyTorch module: returns
    (log_probs (1, V), hidden (1, 1, H))."""
    tokens = jnp.asarray(token, dtype=jnp.int32).reshape(1)
    logp, h_new = decoder_rnn_decode(tokens, hidden, prep)
    return logp, h_new


def _reference_decode(tokens, hidden, params):
    """Pure-JAX f32 reference mirroring the PyTorch module step-by-step."""
    H = params["emb"].shape[1]
    h = hidden.reshape(1, H)
    outs = []
    for t in range(tokens.shape[0]):
        x = jnp.maximum(params["emb"][tokens[t]].reshape(1, H), 0.0)
        gi = x @ params["w_ih"].T + params["b_ih"]
        gh = h @ params["w_hh"].T + params["b_hh"]
        r = jax.nn.sigmoid(gi[:, 0:H] + gh[:, 0:H])
        z = jax.nn.sigmoid(gi[:, H:2 * H] + gh[:, H:2 * H])
        n = jnp.tanh(gi[:, 2 * H:3 * H] + r * gh[:, 2 * H:3 * H])
        h = (1.0 - z) * n + z * h
        logits = h @ params["w_out"].T + params["b_out"]
        outs.append(jax.nn.log_softmax(logits, axis=1))
    return jnp.concatenate(outs, axis=0), h.reshape(1, 1, H)


def init_params(key, hidden_size, output_size):
    ks = jax.random.split(key, 7)
    s = 0.1
    return {
        "emb":   jax.random.normal(ks[0], (output_size, hidden_size), jnp.float32) * s,
        "w_ih":  jax.random.normal(ks[1], (3 * hidden_size, hidden_size), jnp.float32) * s,
        "w_hh":  jax.random.normal(ks[2], (3 * hidden_size, hidden_size), jnp.float32) * s,
        "b_ih":  jax.random.normal(ks[3], (3 * hidden_size,), jnp.float32) * s,
        "b_hh":  jax.random.normal(ks[4], (3 * hidden_size,), jnp.float32) * s,
        "w_out": jax.random.normal(ks[5], (output_size, hidden_size), jnp.float32) * s,
        "b_out": jax.random.normal(ks[6], (output_size,), jnp.float32) * s,
    }


if __name__ == "__main__":
    hidden_size = 32
    output_size = 128   # vocab size
    T = 8               # fused decode steps

    key = jax.random.PRNGKey(0)
    k_param, k_tok, k_hid = jax.random.split(key, 3)

    params = init_params(k_param, hidden_size, output_size)
    prep = prepare_params(params)   # one-time repack (transposes hoisted out of hot path)

    tokens = jax.random.randint(k_tok, (T,), 0, output_size, dtype=jnp.int32)
    hidden = jax.random.normal(k_hid, (1, 1, hidden_size), jnp.float32) * 0.1

    # Fused multi-step decode (one pallas_call for all T tokens).
    log_probs, h_new = decoder_rnn_decode(tokens, hidden, prep)
    jax.block_until_ready((log_probs, h_new))

    # Single-step call for interface parity with the original module.
    lp1, h1 = decoder_rnn_forward(tokens[0], hidden, prep)
    jax.block_until_ready((lp1, h1))

    ref_lp, ref_h = _reference_decode(tokens, hidden, params)
    assert log_probs.shape == (T, output_size)
    assert h_new.shape == (1, 1, hidden_size)
    assert lp1.shape == (1, output_size) and h1.shape == (1, 1, hidden_size)
    assert jnp.allclose(log_probs, ref_lp, atol=2e-2, rtol=2e-2), \
        float(jnp.max(jnp.abs(log_probs - ref_lp)))
    assert jnp.allclose(h_new, ref_h, atol=2e-2, rtol=2e-2)
    assert jnp.allclose(lp1, ref_lp[:1], atol=2e-2, rtol=2e-2)

    print("KERNEL_OK")
</pallas_src>

<mosaic_0001>
module attributes {stable_mosaic.version = 11 : i64} {
  func.func @decoder_rnn_kernel(%arg0: memref<8xi32, #tpu.memory_space<smem>>, %arg1: memref<1x128xf32, #tpu.memory_space<vmem>>, %arg2: memref<128x128xf32, #tpu.memory_space<vmem>>, %arg3: memref<128x384xbf16, #tpu.memory_space<vmem>>, %arg4: memref<128x384xbf16, #tpu.memory_space<vmem>>, %arg5: memref<1x384xf32, #tpu.memory_space<vmem>>, %arg6: memref<1x384xf32, #tpu.memory_space<vmem>>, %arg7: memref<128x128xbf16, #tpu.memory_space<vmem>>, %arg8: memref<1x128xf32, #tpu.memory_space<vmem>>, %arg9: memref<8x128xf32, #tpu.memory_space<vmem>>, %arg10: memref<1x128xf32, #tpu.memory_space<vmem>>, %arg11: memref<8x128xf32, #tpu.memory_space<vmem>>, %arg12: memref<8x384xf32, #tpu.memory_space<vmem>>, %arg13: memref<8x128xf32, #tpu.memory_space<vmem>>) attributes {dimension_semantics = [], scalar_prefetch = 0 : i64, scratch_operands = 3 : i64, tpu.core_type = #tpu.core_type<tc>} {
    %c0_i32 = arith.constant 0 : i32
    %0 = arith.index_cast %c0_i32 : i32 to index
    %1 = memref.load %arg0[%0] : memref<8xi32, #tpu.memory_space<smem>>
    %2 = arith.index_cast %1 : i32 to index
    %c0 = arith.constant 0 : index
    %3 = vector.load %arg2[%2, %c0] : memref<128x128xf32, #tpu.memory_space<vmem>>, vector<1x128xf32>
    %cst = arith.constant 0.000000e+00 : f32
    %4 = vector.broadcast %cst : f32 to vector<1x128xf32>
    %5 = arith.maximumf %3, %4 : vector<1x128xf32>
    %6 = arith.index_cast %c0_i32 : i32 to index
    %c0_0 = arith.constant 0 : index
    %7 = vector.load %arg11[%6, %c0_0] : memref<8x128xf32, #tpu.memory_space<vmem>>, vector<1x128xf32>
    tpu.vector_store %arg11[%6, %c0_0], %5 {strides = array<i32>} : memref<8x128xf32, #tpu.memory_space<vmem>>, vector<1x128xf32>,
    %c1_i32 = arith.constant 1 : i32
    %8 = arith.index_cast %c1_i32 : i32 to index
    %9 = memref.load %arg0[%8] : memref<8xi32, #tpu.memory_space<smem>>
    %10 = arith.index_cast %9 : i32 to index
    %c0_1 = arith.constant 0 : index
    %11 = vector.load %arg2[%10, %c0_1] : memref<128x128xf32, #tpu.memory_space<vmem>>, vector<1x128xf32>
    %cst_2 = arith.constant 0.000000e+00 : f32
    %12 = vector.broadcast %cst_2 : f32 to vector<1x128xf32>
    %13 = arith.maximumf %11, %12 : vector<1x128xf32>
    %14 = arith.index_cast %c1_i32 : i32 to index
    %c0_3 = arith.constant 0 : index
    %15 = vector.load %arg11[%14, %c0_3] : memref<8x128xf32, #tpu.memory_space<vmem>>, vector<1x128xf32>
    tpu.vector_store %arg11[%14, %c0_3], %13 {strides = array<i32>} : memref<8x128xf32, #tpu.memory_space<vmem>>, vector<1x128xf32>,
    %c2_i32 = arith.constant 2 : i32
    %16 = arith.index_cast %c2_i32 : i32 to index
    %17 = memref.load %arg0[%16] : memref<8xi32, #tpu.memory_space<smem>>
    %18 = arith.index_cast %17 : i32 to index
    %c0_4 = arith.constant 0 : index
    %19 = vector.load %arg2[%18, %c0_4] : memref<128x128xf32, #tpu.memory_space<vmem>>, vector<1x128xf32>
    %cst_5 = arith.constant 0.000000e+00 : f32
    %20 = vector.broadcast %cst_5 : f32 to vector<1x128xf32>
    %21 = arith.maximumf %19, %20 : vector<1x128xf32>
    %22 = arith.index_cast %c2_i32 : i32 to index
    %c0_6 = arith.constant 0 : index
    %23 = vector.load %arg11[%22, %c0_6] : memref<8x128xf32, #tpu.memory_space<vmem>>, vector<1x128xf32>
    tpu.vector_store %arg11[%22, %c0_6], %21 {strides = array<i32>} : memref<8x128xf32, #tpu.memory_space<vmem>>, vector<1x128xf32>,
    %c3_i32 = arith.constant 3 : i32
    %24 = arith.index_cast %c3_i32 : i32 to index
    %25 = memref.load %arg0[%24] : memref<8xi32, #tpu.memory_space<smem>>
    %26 = arith.index_cast %25 : i32 to index
    %c0_7 = arith.constant 0 : index
    %27 = vector.load %arg2[%26, %c0_7] : memref<128x128xf32, #tpu.memory_space<vmem>>, vector<1x128xf32>
    %cst_8 = arith.constant 0.000000e+00 : f32
    %28 = vector.broadcast %cst_8 : f32 to vector<1x128xf32>
    %29 = arith.maximumf %27, %28 : vector<1x128xf32>
    %30 = arith.index_cast %c3_i32 : i32 to index
    %c0_9 = arith.constant 0 : index
    %31 = vector.load %arg11[%30, %c0_9] : memref<8x128xf32, #tpu.memory_space<vmem>>, vector<1x128xf32>
    tpu.vector_store %arg11[%30, %c0_9], %29 {strides = array<i32>} : memref<8x128xf32, #tpu.memory_space<vmem>>, vector<1x128xf32>,
    %c4_i32 = arith.constant 4 : i32
    %32 = arith.index_cast %c4_i32 : i32 to index
    %33 = memref.load %arg0[%32] : memref<8xi32, #tpu.memory_space<smem>>
    %34 = arith.index_cast %33 : i32 to index
    %c0_10 = arith.constant 0 : index
    %35 = vector.load %arg2[%34, %c0_10] : memref<128x128xf32, #tpu.memory_space<vmem>>, vector<1x128xf32>
    %cst_11 = arith.constant 0.000000e+00 : f32
    %36 = vector.broadcast %cst_11 : f32 to vector<1x128xf32>
    %37 = arith.maximumf %35, %36 : vector<1x128xf32>
    %38 = arith.index_cast %c4_i32 : i32 to index
    %c0_12 = arith.constant 0 : index
    %39 = vector.load %arg11[%38, %c0_12] : memref<8x128xf32, #tpu.memory_space<vmem>>, vector<1x128xf32>
    tpu.vector_store %arg11[%38, %c0_12], %37 {strides = array<i32>} : memref<8x128xf32, #tpu.memory_space<vmem>>, vector<1x128xf32>,
    %c5_i32 = arith.constant 5 : i32
    %40 = arith.index_cast %c5_i32 : i32 to index
    %41 = memref.load %arg0[%40] : memref<8xi32, #tpu.memory_space<smem>>
    %42 = arith.index_cast %41 : i32 to index
    %c0_13 = arith.constant 0 : index
    %43 = vector.load %arg2[%42, %c0_13] : memref<128x128xf32, #tpu.memory_space<vmem>>, vector<1x128xf32>
    %cst_14 = arith.constant 0.000000e+00 : f32
    %44 = vector.broadcast %cst_14 : f32 to vector<1x128xf32>
    %45 = arith.maximumf %43, %44 : vector<1x128xf32>
    %46 = arith.index_cast %c5_i32 : i32 to index
    %c0_15 = arith.constant 0 : index
    %47 = vector.load %arg11[%46, %c0_15] : memref<8x128xf32, #tpu.memory_space<vmem>>, vector<1x128xf32>
    tpu.vector_store %arg11[%46, %c0_15], %45 {strides = array<i32>} : memref<8x128xf32, #tpu.memory_space<vmem>>, vector<1x128xf32>,
    %c6_i32 = arith.constant 6 : i32
    %48 = arith.index_cast %c6_i32 : i32 to index
    %49 = memref.load %arg0[%48] : memref<8xi32, #tpu.memory_space<smem>>
    %50 = arith.index_cast %49 : i32 to index
    %c0_16 = arith.constant 0 : index
    %51 = vector.load %arg2[%50, %c0_16] : memref<128x128xf32, #tpu.memory_space<vmem>>, vector<1x128xf32>
    %cst_17 = arith.constant 0.000000e+00 : f32
    %52 = vector.broadcast %cst_17 : f32 to vector<1x128xf32>
    %53 = arith.maximumf %51, %52 : vector<1x128xf32>
    %54 = arith.index_cast %c6_i32 : i32 to index
    %c0_18 = arith.constant 0 : index
    %55 = vector.load %arg11[%54, %c0_18] : memref<8x128xf32, #tpu.memory_space<vmem>>, vector<1x128xf32>
    tpu.vector_store %arg11[%54, %c0_18], %53 {strides = array<i32>} : memref<8x128xf32, #tpu.memory_space<vmem>>, vector<1x128xf32>,
    %c7_i32 = arith.constant 7 : i32
    %56 = arith.index_cast %c7_i32 : i32 to index
    %57 = memref.load %arg0[%56] : memref<8xi32, #tpu.memory_space<smem>>
    %58 = arith.index_cast %57 : i32 to index
    %c0_19 = arith.constant 0 : index
    %59 = vector.load %arg2[%58, %c0_19] : memref<128x128xf32, #tpu.memory_space<vmem>>, vector<1x128xf32>
    %cst_20 = arith.constant 0.000000e+00 : f32
    %60 = vector.broadcast %cst_20 : f32 to vector<1x128xf32>
    %61 = arith.maximumf %59, %60 : vector<1x128xf32>
    %62 = arith.index_cast %c7_i32 : i32 to index
    %c0_21 = arith.constant 0 : index
    %63 = vector.load %arg11[%62, %c0_21] : memref<8x128xf32, #tpu.memory_space<vmem>>, vector<1x128xf32>
    tpu.vector_store %arg11[%62, %c0_21], %61 {strides = array<i32>} : memref<8x128xf32, #tpu.memory_space<vmem>>, vector<1x128xf32>,
    %c8_i32 = arith.constant 8 : i32
    %c0_22 = arith.constant 0 : index
    %c0_23 = arith.constant 0 : index
    %64 = vector.load %arg11[%c0_22, %c0_23] : memref<8x128xf32, #tpu.memory_space<vmem>>, vector<8x128xf32>
    %65 = arith.truncf %64 : vector<8x128xf32> to vector<8x128xbf16>
    %c0_24 = arith.constant 0 : index
    %c0_25 = arith.constant 0 : index
    %66 = vector.load %arg3[%c0_24, %c0_25] : memref<128x384xbf16, #tpu.memory_space<vmem>>, vector<128x384xbf16>
    %cst_26 = arith.constant dense<0.000000e+00> : vector<8x384xf32>
    %67 = tpu.matmul %65, %66, %cst_26 {dimension_numbers = #tpu.dot_dimension_numbers<[1], [0], [0], [1], [0, 0, 1, 1], [], []>} : vector<8x128xbf16>, vector<128x384xbf16>, vector<8x384xf32> -> vector<8x384xf32>
    %c0_27 = arith.constant 0 : index
    %c0_28 = arith.constant 0 : index
    %68 = vector.load %arg5[%c0_27, %c0_28] : memref<1x384xf32, #tpu.memory_space<vmem>>, vector<1x384xf32>
    %69 = vector.broadcast %68 : vector<1x384xf32> to vector<8x384xf32>
    %70 = arith.addf %67, %69 : vector<8x384xf32>
    %c0_29 = arith.constant 0 : index
    %c0_30 = arith.constant 0 : index
    %71 = vector.load %arg12[%c0_29, %c0_30] : memref<8x384xf32, #tpu.memory_space<vmem>>, vector<8x384xf32>
    tpu.vector_store %arg12[%c0_29, %c0_30], %70 {strides = array<i32>} : memref<8x384xf32, #tpu.memory_space<vmem>>, vector<8x384xf32>,
    %c0_31 = arith.constant 0 : index
    %c0_32 = arith.constant 0 : index
    %72 = vector.load %arg4[%c0_31, %c0_32] : memref<128x384xbf16, #tpu.memory_space<vmem>>, vector<128x384xbf16>
    %c0_33 = arith.constant 0 : index
    %c0_34 = arith.constant 0 : index
    %73 = vector.load %arg6[%c0_33, %c0_34] : memref<1x384xf32, #tpu.memory_space<vmem>>, vector<1x384xf32>
    %c0_35 = arith.constant 0 : index
    %c0_36 = arith.constant 0 : index
    %74 = vector.load %arg1[%c0_35, %c0_36] : memref<1x128xf32, #tpu.memory_space<vmem>>, vector<1x128xf32>
    %c0_i32_37 = arith.constant 0 : i32
    %75 = arith.truncf %74 : vector<1x128xf32> to vector<1x128xbf16>
    %cst_38 = arith.constant dense<0.000000e+00> : vector<1x384xf32>
    %76 = tpu.matmul %75, %72, %cst_38 {dimension_numbers = #tpu.dot_dimension_numbers<[1], [0], [0], [1], [0, 0, 1, 1], [], []>} : vector<1x128xbf16>, vector<128x384xbf16>, vector<1x384xf32> -> vector<1x384xf32>
    %77 = arith.addf %76, %73 : vector<1x384xf32>
    %78 = arith.index_cast %c0_i32_37 : i32 to index
    %c0_39 = arith.constant 0 : index
    %79 = vector.load %arg12[%78, %c0_39] : memref<8x384xf32, #tpu.memory_space<vmem>>, vector<1x384xf32>
    %80 = vector.extract_strided_slice %79 {offsets = [0, 0], sizes = [1, 128], strides = [1, 1]} : vector<1x384xf32> to vector<1x128xf32>
    %81 = vector.extract_strided_slice %77 {offsets = [0, 0], sizes = [1, 128], strides = [1, 1]} : vector<1x384xf32> to vector<1x128xf32>
    %82 = arith.addf %80, %81 : vector<1x128xf32>
    %83 = arith.negf %82 : vector<1x128xf32>
    %84 = math.exp %83 : vector<1x128xf32>
    %cst_40 = arith.constant 1.000000e+00 : f32
    %85 = vector.broadcast %cst_40 : f32 to vector<1x128xf32>
    %86 = arith.addf %85, %84 : vector<1x128xf32>
    %87 = arith.divf %85, %86 : vector<1x128xf32>
    %88 = vector.extract_strided_slice %79 {offsets = [0, 128], sizes = [1, 128], strides = [1, 1]} : vector<1x384xf32> to vector<1x128xf32>
    %89 = vector.extract_strided_slice %77 {offsets = [0, 128], sizes = [1, 128], strides = [1, 1]} : vector<1x384xf32> to vector<1x128xf32>
    %90 = arith.addf %88, %89 : vector<1x128xf32>
    %91 = arith.negf %90 : vector<1x128xf32>
    %92 = math.exp %91 : vector<1x128xf32>
    %cst_41 = arith.constant 1.000000e+00 : f32
    %93 = vector.broadcast %cst_41 : f32 to vector<1x128xf32>
    %94 = arith.addf %93, %92 : vector<1x128xf32>
    %95 = arith.divf %93, %94 : vector<1x128xf32>
    %96 = vector.extract_strided_slice %79 {offsets = [0, 256], sizes = [1, 128], strides = [1, 1]} : vector<1x384xf32> to vector<1x128xf32>
    %97 = vector.extract_strided_slice %77 {offsets = [0, 256], sizes = [1, 128], strides = [1, 1]} : vector<1x384xf32> to vector<1x128xf32>
    %98 = arith.mulf %87, %97 : vector<1x128xf32>
    %99 = arith.addf %96, %98 : vector<1x128xf32>
    %100 = math.tanh %99 : vector<1x128xf32>
    %cst_42 = arith.constant 1.000000e+00 : f32
    %101 = vector.broadcast %cst_42 : f32 to vector<1x128xf32>
    %102 = arith.subf %101, %95 : vector<1x128xf32>
    %103 = arith.mulf %102, %100 : vector<1x128xf32>
    %104 = arith.mulf %95, %74 : vector<1x128xf32>
    %105 = arith.addf %103, %104 : vector<1x128xf32>
    %106 = arith.index_cast %c0_i32_37 : i32 to index
    %c0_43 = arith.constant 0 : index
    %107 = vector.load %arg13[%106, %c0_43] : memref<8x128xf32, #tpu.memory_space<vmem>>, vector<1x128xf32>
    tpu.vector_store %arg13[%106, %c0_43], %105 {strides = array<i32>} : memref<8x128xf32, #tpu.memory_space<vmem>>, vector<1x128xf32>,
    %c1_i32_44 = arith.constant 1 : i32
    %108 = arith.truncf %105 : vector<1x128xf32> to vector<1x128xbf16>
    %cst_45 = arith.constant dense<0.000000e+00> : vector<1x384xf32>
    %109 = tpu.matmul %108, %72, %cst_45 {dimension_numbers = #tpu.dot_dimension_numbers<[1], [0], [0], [1], [0, 0, 1, 1], [], []>} : vector<1x128xbf16>, vector<128x384xbf16>, vector<1x384xf32> -> vector<1x384xf32>
    %110 = arith.addf %109, %73 : vector<1x384xf32>
    %111 = arith.index_cast %c1_i32_44 : i32 to index
    %c0_46 = arith.constant 0 : index
    %112 = vector.load %arg12[%111, %c0_46] : memref<8x384xf32, #tpu.memory_space<vmem>>, vector<1x384xf32>
    %113 = vector.extract_strided_slice %112 {offsets = [0, 0], sizes = [1, 128], strides = [1, 1]} : vector<1x384xf32> to vector<1x128xf32>
    %114 = vector.extract_strided_slice %110 {offsets = [0, 0], sizes = [1, 128], strides = [1, 1]} : vector<1x384xf32> to vector<1x128xf32>
    %115 = arith.addf %113, %114 : vector<1x128xf32>
    %116 = arith.negf %115 : vector<1x128xf32>
    %117 = math.exp %116 : vector<1x128xf32>
    %cst_47 = arith.constant 1.000000e+00 : f32
    %118 = vector.broadcast %cst_47 : f32 to vector<1x128xf32>
    %119 = arith.addf %118, %117 : vector<1x128xf32>
    %120 = arith.divf %118, %119 : vector<1x128xf32>
    %121 = vector.extract_strided_slice %112 {offsets = [0, 128], sizes = [1, 128], strides = [1, 1]} : vector<1x384xf32> to vector<1x128xf32>
    %122 = vector.extract_strided_slice %110 {offsets = [0, 128], sizes = [1, 128], strides = [1, 1]} : vector<1x384xf32> to vector<1x128xf32>
    %123 = arith.addf %121, %122 : vector<1x128xf32>
    %124 = arith.negf %123 : vector<1x128xf32>
    %125 = math.exp %124 : vector<1x128xf32>
    %cst_48 = arith.constant 1.000000e+00 : f32
    %126 = vector.broadcast %cst_48 : f32 to vector<1x128xf32>
    %127 = arith.addf %126, %125 : vector<1x128xf32>
    %128 = arith.divf %126, %127 : vector<1x128xf32>
    %129 = vector.extract_strided_slice %112 {offsets = [0, 256], sizes = [1, 128], strides = [1, 1]} : vector<1x384xf32> to vector<1x128xf32>
    %130 = vector.extract_strided_slice %110 {offsets = [0, 256], sizes = [1, 128], strides = [1, 1]} : vector<1x384xf32> to vector<1x128xf32>
    %131 = arith.mulf %120, %130 : vector<1x128xf32>
    %132 = arith.addf %129, %131 : vector<1x128xf32>
    %133 = math.tanh %132 : vector<1x128xf32>
    %cst_49 = arith.constant 1.000000e+00 : f32
    %134 = vector.broadcast %cst_49 : f32 to vector<1x128xf32>
    %135 = arith.subf %134, %128 : vector<1x128xf32>
    %136 = arith.mulf %135, %133 : vector<1x128xf32>
    %137 = arith.mulf %128, %105 : vector<1x128xf32>
    %138 = arith.addf %136, %137 : vector<1x128xf32>
    %139 = arith.index_cast %c1_i32_44 : i32 to index
    %c0_50 = arith.constant 0 : index
    %140 = vector.load %arg13[%139, %c0_50] : memref<8x128xf32, #tpu.memory_space<vmem>>, vector<1x128xf32>
    tpu.vector_store %arg13[%139, %c0_50], %138 {strides = array<i32>} : memref<8x128xf32, #tpu.memory_space<vmem>>, vector<1x128xf32>,
    %c2_i32_51 = arith.constant 2 : i32
    %141 = arith.truncf %138 : vector<1x128xf32> to vector<1x128xbf16>
    %cst_52 = arith.constant dense<0.000000e+00> : vector<1x384xf32>
    %142 = tpu.matmul %141, %72, %cst_52 {dimension_numbers = #tpu.dot_dimension_numbers<[1], [0], [0], [1], [0, 0, 1, 1], [], []>} : vector<1x128xbf16>, vector<128x384xbf16>, vector<1x384xf32> -> vector<1x384xf32>
    %143 = arith.addf %142, %73 : vector<1x384xf32>
    %144 = arith.index_cast %c2_i32_51 : i32 to index
    %c0_53 = arith.constant 0 : index
    %145 = vector.load %arg12[%144, %c0_53] : memref<8x384xf32, #tpu.memory_space<vmem>>, vector<1x384xf32>
    %146 = vector.extract_strided_slice %145 {offsets = [0, 0], sizes = [1, 128], strides = [1, 1]} : vector<1x384xf32> to vector<1x128xf32>
    %147 = vector.extract_strided_slice %143 {offsets = [0, 0], sizes = [1, 128], strides = [1, 1]} : vector<1x384xf32> to vector<1x128xf32>
    %148 = arith.addf %146, %147 : vector<1x128xf32>
    %149 = arith.negf %148 : vector<1x128xf32>
    %150 = math.exp %149 : vector<1x128xf32>
    %cst_54 = arith.constant 1.000000e+00 : f32
    %151 = vector.broadcast %cst_54 : f32 to vector<1x128xf32>
    %152 = arith.addf %151, %150 : vector<1x128xf32>
    %153 = arith.divf %151, %152 : vector<1x128xf32>
    %154 = vector.extract_strided_slice %145 {offsets = [0, 128], sizes = [1, 128], strides = [1, 1]} : vector<1x384xf32> to vector<1x128xf32>
    %155 = vector.extract_strided_slice %143 {offsets = [0, 128], sizes = [1, 128], strides = [1, 1]} : vector<1x384xf32> to vector<1x128xf32>
    %156 = arith.addf %154, %155 : vector<1x128xf32>
    %157 = arith.negf %156 : vector<1x128xf32>
    %158 = math.exp %157 : vector<1x128xf32>
    %cst_55 = arith.constant 1.000000e+00 : f32
    %159 = vector.broadcast %cst_55 : f32 to vector<1x128xf32>
    %160 = arith.addf %159, %158 : vector<1x128xf32>
    %161 = arith.divf %159, %160 : vector<1x128xf32>
    %162 = vector.extract_strided_slice %145 {offsets = [0, 256], sizes = [1, 128], strides = [1, 1]} : vector<1x384xf32> to vector<1x128xf32>
    %163 = vector.extract_strided_slice %143 {offsets = [0, 256], sizes = [1, 128], strides = [1, 1]} : vector<1x384xf32> to vector<1x128xf32>
    %164 = arith.mulf %153, %163 : vector<1x128xf32>
    %165 = arith.addf %162, %164 : vector<1x128xf32>
    %166 = math.tanh %165 : vector<1x128xf32>
    %cst_56 = arith.constant 1.000000e+00 : f32
    %167 = vector.broadcast %cst_56 : f32 to vector<1x128xf32>
    %168 = arith.subf %167, %161 : vector<1x128xf32>
    %169 = arith.mulf %168, %166 : vector<1x128xf32>
    %170 = arith.mulf %161, %138 : vector<1x128xf32>
    %171 = arith.addf %169, %170 : vector<1x128xf32>
    %172 = arith.index_cast %c2_i32_51 : i32 to index
    %c0_57 = arith.constant 0 : index
    %173 = vector.load %arg13[%172, %c0_57] : memref<8x128xf32, #tpu.memory_space<vmem>>, vector<1x128xf32>
    tpu.vector_store %arg13[%172, %c0_57], %171 {strides = array<i32>} : memref<8x128xf32, #tpu.memory_space<vmem>>, vector<1x128xf32>,
    %c3_i32_58 = arith.constant 3 : i32
    %174 = arith.truncf %171 : vector<1x128xf32> to vector<1x128xbf16>
    %cst_59 = arith.constant dense<0.000000e+00> : vector<1x384xf32>
    %175 = tpu.matmul %174, %72, %cst_59 {dimension_numbers = #tpu.dot_dimension_numbers<[1], [0], [0], [1], [0, 0, 1, 1], [], []>} : vector<1x128xbf16>, vector<128x384xbf16>, vector<1x384xf32> -> vector<1x384xf32>
    %176 = arith.addf %175, %73 : vector<1x384xf32>
    %177 = arith.index_cast %c3_i32_58 : i32 to index
    %c0_60 = arith.constant 0 : index
    %178 = vector.load %arg12[%177, %c0_60] : memref<8x384xf32, #tpu.memory_space<vmem>>, vector<1x384xf32>
    %179 = vector.extract_strided_slice %178 {offsets = [0, 0], sizes = [1, 128], strides = [1, 1]} : vector<1x384xf32> to vector<1x128xf32>
    %180 = vector.extract_strided_slice %176 {offsets = [0, 0], sizes = [1, 128], strides = [1, 1]} : vector<1x384xf32> to vector<1x128xf32>
    %181 = arith.addf %179, %180 : vector<1x128xf32>
    %182 = arith.negf %181 : vector<1x128xf32>
    %183 = math.exp %182 : vector<1x128xf32>
    %cst_61 = arith.constant 1.000000e+00 : f32
    %184 = vector.broadcast %cst_61 : f32 to vector<1x128xf32>
    %185 = arith.addf %184, %183 : vector<1x128xf32>
    %186 = arith.divf %184, %185 : vector<1x128xf32>
    %187 = vector.extract_strided_slice %178 {offsets = [0, 128], sizes = [1, 128], strides = [1, 1]} : vector<1x384xf32> to vector<1x128xf32>
    %188 = vector.extract_strided_slice %176 {offsets = [0, 128], sizes = [1, 128], strides = [1, 1]} : vector<1x384xf32> to vector<1x128xf32>
    %189 = arith.addf %187, %188 : vector<1x128xf32>
    %190 = arith.negf %189 : vector<1x128xf32>
    %191 = math.exp %190 : vector<1x128xf32>
    %cst_62 = arith.constant 1.000000e+00 : f32
    %192 = vector.broadcast %cst_62 : f32 to vector<1x128xf32>
    %193 = arith.addf %192, %191 : vector<1x128xf32>
    %194 = arith.divf %192, %193 : vector<1x128xf32>
    %195 = vector.extract_strided_slice %178 {offsets = [0, 256], sizes = [1, 128], strides = [1, 1]} : vector<1x384xf32> to vector<1x128xf32>
    %196 = vector.extract_strided_slice %176 {offsets = [0, 256], sizes = [1, 128], strides = [1, 1]} : vector<1x384xf32> to vector<1x128xf32>
    %197 = arith.mulf %186, %196 : vector<1x128xf32>
    %198 = arith.addf %195, %197 : vector<1x128xf32>
    %199 = math.tanh %198 : vector<1x128xf32>
    %cst_63 = arith.constant 1.000000e+00 : f32
    %200 = vector.broadcast %cst_63 : f32 to vector<1x128xf32>
    %201 = arith.subf %200, %194 : vector<1x128xf32>
    %202 = arith.mulf %201, %199 : vector<1x128xf32>
    %203 = arith.mulf %194, %171 : vector<1x128xf32>
    %204 = arith.addf %202, %203 : vector<1x128xf32>
    %205 = arith.index_cast %c3_i32_58 : i32 to index
    %c0_64 = arith.constant 0 : index
    %206 = vector.load %arg13[%205, %c0_64] : memref<8x128xf32, #tpu.memory_space<vmem>>, vector<1x128xf32>
    tpu.vector_store %arg13[%205, %c0_64], %204 {strides = array<i32>} : memref<8x128xf32, #tpu.memory_space<vmem>>, vector<1x128xf32>,
    %c4_i32_65 = arith.constant 4 : i32
    %207 = arith.truncf %204 : vector<1x128xf32> to vector<1x128xbf16>
    %cst_66 = arith.constant dense<0.000000e+00> : vector<1x384xf32>
    %208 = tpu.matmul %207, %72, %cst_66 {dimension_numbers = #tpu.dot_dimension_numbers<[1], [0], [0], [1], [0, 0, 1, 1], [], []>} : vector<1x128xbf16>, vector<128x384xbf16>, vector<1x384xf32> -> vector<1x384xf32>
    %209 = arith.addf %208, %73 : vector<1x384xf32>
    %210 = arith.index_cast %c4_i32_65 : i32 to index
    %c0_67 = arith.constant 0 : index
    %211 = vector.load %arg12[%210, %c0_67] : memref<8x384xf32, #tpu.memory_space<vmem>>, vector<1x384xf32>
    %212 = vector.extract_strided_slice %211 {offsets = [0, 0], sizes = [1, 128], strides = [1, 1]} : vector<1x384xf32> to vector<1x128xf32>
    %213 = vector.extract_strided_slice %209 {offsets = [0, 0], sizes = [1, 128], strides = [1, 1]} : vector<1x384xf32> to vector<1x128xf32>
    %214 = arith.addf %212, %213 : vector<1x128xf32>
    %215 = arith.negf %214 : vector<1x128xf32>
    %216 = math.exp %215 : vector<1x128xf32>
    %cst_68 = arith.constant 1.000000e+00 : f32
    %217 = vector.broadcast %cst_68 : f32 to vector<1x128xf32>
    %218 = arith.addf %217, %216 : vector<1x128xf32>
    %219 = arith.divf %217, %218 : vector<1x128xf32>
    %220 = vector.extract_strided_slice %211 {offsets = [0, 128], sizes = [1, 128], strides = [1, 1]} : vector<1x384xf32> to vector<1x128xf32>
    %221 = vector.extract_strided_slice %209 {offsets = [0, 128], sizes = [1, 128], strides = [1, 1]} : vector<1x384xf32> to vector<1x128xf32>
    %222 = arith.addf %220, %221 : vector<1x128xf32>
    %223 = arith.negf %222 : vector<1x128xf32>
    %224 = math.exp %223 : vector<1x128xf32>
    %cst_69 = arith.constant 1.000000e+00 : f32
    %225 = vector.broadcast %cst_69 : f32 to vector<1x128xf32>
    %226 = arith.addf %225, %224 : vector<1x128xf32>
    %227 = arith.divf %225, %226 : vector<1x128xf32>
    %228 = vector.extract_strided_slice %211 {offsets = [0, 256], sizes = [1, 128], strides = [1, 1]} : vector<1x384xf32> to vector<1x128xf32>
    %229 = vector.extract_strided_slice %209 {offsets = [0, 256], sizes = [1, 128], strides = [1, 1]} : vector<1x384xf32> to vector<1x128xf32>
    %230 = arith.mulf %219, %229 : vector<1x128xf32>
    %231 = arith.addf %228, %230 : vector<1x128xf32>
    %232 = math.tanh %231 : vector<1x128xf32>
    %cst_70 = arith.constant 1.000000e+00 : f32
    %233 = vector.broadcast %cst_70 : f32 to vector<1x128xf32>
    %234 = arith.subf %233, %227 : vector<1x128xf32>
    %235 = arith.mulf %234, %232 : vector<1x128xf32>
    %236 = arith.mulf %227, %204 : vector<1x128xf32>
    %237 = arith.addf %235, %236 : vector<1x128xf32>
    %238 = arith.index_cast %c4_i32_65 : i32 to index
    %c0_71 = arith.constant 0 : index
    %239 = vector.load %arg13[%238, %c0_71] : memref<8x128xf32, #tpu.memory_space<vmem>>, vector<1x128xf32>
    tpu.vector_store %arg13[%238, %c0_71], %237 {strides = array<i32>} : memref<8x128xf32, #tpu.memory_space<vmem>>, vector<1x128xf32>,
    %c5_i32_72 = arith.constant 5 : i32
    %240 = arith.truncf %237 : vector<1x128xf32> to vector<1x128xbf16>
    %cst_73 = arith.constant dense<0.000000e+00> : vector<1x384xf32>
    %241 = tpu.matmul %240, %72, %cst_73 {dimension_numbers = #tpu.dot_dimension_numbers<[1], [0], [0], [1], [0, 0, 1, 1], [], []>} : vector<1x128xbf16>, vector<128x384xbf16>, vector<1x384xf32> -> vector<1x384xf32>
    %242 = arith.addf %241, %73 : vector<1x384xf32>
    %243 = arith.index_cast %c5_i32_72 : i32 to index
    %c0_74 = arith.constant 0 : index
    %244 = vector.load %arg12[%243, %c0_74] : memref<8x384xf32, #tpu.memory_space<vmem>>, vector<1x384xf32>
    %245 = vector.extract_strided_slice %244 {offsets = [0, 0], sizes = [1, 128], strides = [1, 1]} : vector<1x384xf32> to vector<1x128xf32>
    %246 = vector.extract_strided_slice %242 {offsets = [0, 0], sizes = [1, 128], strides = [1, 1]} : vector<1x384xf32> to vector<1x128xf32>
    %247 = arith.addf %245, %246 : vector<1x128xf32>
    %248 = arith.negf %247 : vector<1x128xf32>
    %249 = math.exp %248 : vector<1x128xf32>
    %cst_75 = arith.constant 1.000000e+00 : f32
    %250 = vector.broadcast %cst_75 : f32 to vector<1x128xf32>
    %251 = arith.addf %250, %249 : vector<1x128xf32>
    %252 = arith.divf %250, %251 : vector<1x128xf32>
    %253 = vector.extract_strided_slice %244 {offsets = [0, 128], sizes = [1, 128], strides = [1, 1]} : vector<1x384xf32> to vector<1x128xf32>
    %254 = vector.extract_strided_slice %242 {offsets = [0, 128], sizes = [1, 128], strides = [1, 1]} : vector<1x384xf32> to vector<1x128xf32>
    %255 = arith.addf %253, %254 : vector<1x128xf32>
    %256 = arith.negf %255 : vector<1x128xf32>
    %257 = math.exp %256 : vector<1x128xf32>
    %cst_76 = arith.constant 1.000000e+00 : f32
    %258 = vector.broadcast %cst_76 : f32 to vector<1x128xf32>
    %259 = arith.addf %258, %257 : vector<1x128xf32>
    %260 = arith.divf %258, %259 : vector<1x128xf32>
    %261 = vector.extract_strided_slice %244 {offsets = [0, 256], sizes = [1, 128], strides = [1, 1]} : vector<1x384xf32> to vector<1x128xf32>
    %262 = vector.extract_strided_slice %242 {offsets = [0, 256], sizes = [1, 128], strides = [1, 1]} : vector<1x384xf32> to vector<1x128xf32>
    %263 = arith.mulf %252, %262 : vector<1x128xf32>
    %264 = arith.addf %261, %263 : vector<1x128xf32>
    %265 = math.tanh %264 : vector<1x128xf32>
    %cst_77 = arith.constant 1.000000e+00 : f32
    %266 = vector.broadcast %cst_77 : f32 to vector<1x128xf32>
    %267 = arith.subf %266, %260 : vector<1x128xf32>
    %268 = arith.mulf %267, %265 : vector<1x128xf32>
    %269 = arith.mulf %260, %237 : vector<1x128xf32>
    %270 = arith.addf %268, %269 : vector<1x128xf32>
    %271 = arith.index_cast %c5_i32_72 : i32 to index
    %c0_78 = arith.constant 0 : index
    %272 = vector.load %arg13[%271, %c0_78] : memref<8x128xf32, #tpu.memory_space<vmem>>, vector<1x128xf32>
    tpu.vector_store %arg13[%271, %c0_78], %270 {strides = array<i32>} : memref<8x128xf32, #tpu.memory_space<vmem>>, vector<1x128xf32>,
    %c6_i32_79 = arith.constant 6 : i32
    %273 = arith.truncf %270 : vector<1x128xf32> to vector<1x128xbf16>
    %cst_80 = arith.constant dense<0.000000e+00> : vector<1x384xf32>
    %274 = tpu.matmul %273, %72, %cst_80 {dimension_numbers = #tpu.dot_dimension_numbers<[1], [0], [0], [1], [0, 0, 1, 1], [], []>} : vector<1x128xbf16>, vector<128x384xbf16>, vector<1x384xf32> -> vector<1x384xf32>
    %275 = arith.addf %274, %73 : vector<1x384xf32>
    %276 = arith.index_cast %c6_i32_79 : i32 to index
    %c0_81 = arith.constant 0 : index
    %277 = vector.load %arg12[%276, %c0_81] : memref<8x384xf32, #tpu.memory_space<vmem>>, vector<1x384xf32>
    %278 = vector.extract_strided_slice %277 {offsets = [0, 0], sizes = [1, 128], strides = [1, 1]} : vector<1x384xf32> to vector<1x128xf32>
    %279 = vector.extract_strided_slice %275 {offsets = [0, 0], sizes = [1, 128], strides = [1, 1]} : vector<1x384xf32> to vector<1x128xf32>
    %280 = arith.addf %278, %279 : vector<1x128xf32>
    %281 = arith.negf %280 : vector<1x128xf32>
    %282 = math.exp %281 : vector<1x128xf32>
    %cst_82 = arith.constant 1.000000e+00 : f32
    %283 = vector.broadcast %cst_82 : f32 to vector<1x128xf32>
    %284 = arith.addf %283, %282 : vector<1x128xf32>
    %285 = arith.divf %283, %284 : vector<1x128xf32>
    %286 = vector.extract_strided_slice %277 {offsets = [0, 128], sizes = [1, 128], strides = [1, 1]} : vector<1x384xf32> to vector<1x128xf32>
    %287 = vector.extract_strided_slice %275 {offsets = [0, 128], sizes = [1, 128], strides = [1, 1]} : vector<1x384xf32> to vector<1x128xf32>
    %288 = arith.addf %286, %287 : vector<1x128xf32>
    %289 = arith.negf %288 : vector<1x128xf32>
    %290 = math.exp %289 : vector<1x128xf32>
    %cst_83 = arith.constant 1.000000e+00 : f32
    %291 = vector.broadcast %cst_83 : f32 to vector<1x128xf32>
    %292 = arith.addf %291, %290 : vector<1x128xf32>
    %293 = arith.divf %291, %292 : vector<1x128xf32>
    %294 = vector.extract_strided_slice %277 {offsets = [0, 256], sizes = [1, 128], strides = [1, 1]} : vector<1x384xf32> to vector<1x128xf32>
    %295 = vector.extract_strided_slice %275 {offsets = [0, 256], sizes = [1, 128], strides = [1, 1]} : vector<1x384xf32> to vector<1x128xf32>
    %296 = arith.mulf %285, %295 : vector<1x128xf32>
    %297 = arith.addf %294, %296 : vector<1x128xf32>
    %298 = math.tanh %297 : vector<1x128xf32>
    %cst_84 = arith.constant 1.000000e+00 : f32
    %299 = vector.broadcast %cst_84 : f32 to vector<1x128xf32>
    %300 = arith.subf %299, %293 : vector<1x128xf32>
    %301 = arith.mulf %300, %298 : vector<1x128xf32>
    %302 = arith.mulf %293, %270 : vector<1x128xf32>
    %303 = arith.addf %301, %302 : vector<1x128xf32>
    %304 = arith.index_cast %c6_i32_79 : i32 to index
    %c0_85 = arith.constant 0 : index
    %305 = vector.load %arg13[%304, %c0_85] : memref<8x128xf32, #tpu.memory_space<vmem>>, vector<1x128xf32>
    tpu.vector_store %arg13[%304, %c0_85], %303 {strides = array<i32>} : memref<8x128xf32, #tpu.memory_space<vmem>>, vector<1x128xf32>,
    %c7_i32_86 = arith.constant 7 : i32
    %306 = arith.truncf %303 : vector<1x128xf32> to vector<1x128xbf16>
    %cst_87 = arith.constant dense<0.000000e+00> : vector<1x384xf32>
    %307 = tpu.matmul %306, %72, %cst_87 {dimension_numbers = #tpu.dot_dimension_numbers<[1], [0], [0], [1], [0, 0, 1, 1], [], []>} : vector<1x128xbf16>, vector<128x384xbf16>, vector<1x384xf32> -> vector<1x384xf32>
    %308 = arith.addf %307, %73 : vector<1x384xf32>
    %309 = arith.index_cast %c7_i32_86 : i32 to index
    %c0_88 = arith.constant 0 : index
    %310 = vector.load %arg12[%309, %c0_88] : memref<8x384xf32, #tpu.memory_space<vmem>>, vector<1x384xf32>
    %311 = vector.extract_strided_slice %310 {offsets = [0, 0], sizes = [1, 128], strides = [1, 1]} : vector<1x384xf32> to vector<1x128xf32>
    %312 = vector.extract_strided_slice %308 {offsets = [0, 0], sizes = [1, 128], strides = [1, 1]} : vector<1x384xf32> to vector<1x128xf32>
    %313 = arith.addf %311, %312 : vector<1x128xf32>
    %314 = arith.negf %313 : vector<1x128xf32>
    %315 = math.exp %314 : vector<1x128xf32>
    %cst_89 = arith.constant 1.000000e+00 : f32
    %316 = vector.broadcast %cst_89 : f32 to vector<1x128xf32>
    %317 = arith.addf %316, %315 : vector<1x128xf32>
    %318 = arith.divf %316, %317 : vector<1x128xf32>
    %319 = vector.extract_strided_slice %310 {offsets = [0, 128], sizes = [1, 128], strides = [1, 1]} : vector<1x384xf32> to vector<1x128xf32>
    %320 = vector.extract_strided_slice %308 {offsets = [0, 128], sizes = [1, 128], strides = [1, 1]} : vector<1x384xf32> to vector<1x128xf32>
    %321 = arith.addf %319, %320 : vector<1x128xf32>
    %322 = arith.negf %321 : vector<1x128xf32>
    %323 = math.exp %322 : vector<1x128xf32>
    %cst_90 = arith.constant 1.000000e+00 : f32
    %324 = vector.broadcast %cst_90 : f32 to vector<1x128xf32>
    %325 = arith.addf %324, %323 : vector<1x128xf32>
    %326 = arith.divf %324, %325 : vector<1x128xf32>
    %327 = vector.extract_strided_slice %310 {offsets = [0, 256], sizes = [1, 128], strides = [1, 1]} : vector<1x384xf32> to vector<1x128xf32>
    %328 = vector.extract_strided_slice %308 {offsets = [0, 256], sizes = [1, 128], strides = [1, 1]} : vector<1x384xf32> to vector<1x128xf32>
    %329 = arith.mulf %318, %328 : vector<1x128xf32>
    %330 = arith.addf %327, %329 : vector<1x128xf32>
    %331 = math.tanh %330 : vector<1x128xf32>
    %cst_91 = arith.constant 1.000000e+00 : f32
    %332 = vector.broadcast %cst_91 : f32 to vector<1x128xf32>
    %333 = arith.subf %332, %326 : vector<1x128xf32>
    %334 = arith.mulf %333, %331 : vector<1x128xf32>
    %335 = arith.mulf %326, %303 : vector<1x128xf32>
    %336 = arith.addf %334, %335 : vector<1x128xf32>
    %337 = arith.index_cast %c7_i32_86 : i32 to index
    %c0_92 = arith.constant 0 : index
    %338 = vector.load %arg13[%337, %c0_92] : memref<8x128xf32, #tpu.memory_space<vmem>>, vector<1x128xf32>
    tpu.vector_store %arg13[%337, %c0_92], %336 {strides = array<i32>} : memref<8x128xf32, #tpu.memory_space<vmem>>, vector<1x128xf32>,
    %c8_i32_93 = arith.constant 8 : i32
    %c0_94 = arith.constant 0 : index
    %c0_95 = arith.constant 0 : index
    %339 = vector.load %arg10[%c0_94, %c0_95] : memref<1x128xf32, #tpu.memory_space<vmem>>, vector<1x128xf32>
    tpu.vector_store %arg10[%c0_94, %c0_95], %336 {strides = array<i32>} : memref<1x128xf32, #tpu.memory_space<vmem>>, vector<1x128xf32>,
    %c0_96 = arith.constant 0 : index
    %c0_97 = arith.constant 0 : index
    %340 = vector.load %arg13[%c0_96, %c0_97] : memref<8x128xf32, #tpu.memory_space<vmem>>, vector<8x128xf32>
    %341 = arith.truncf %340 : vector<8x128xf32> to vector<8x128xbf16>
    %c0_98 = arith.constant 0 : index
    %c0_99 = arith.constant 0 : index
    %342 = vector.load %arg7[%c0_98, %c0_99] : memref<128x128xbf16, #tpu.memory_space<vmem>>, vector<128x128xbf16>
    %cst_100 = arith.constant dense<0.000000e+00> : vector<8x128xf32>
    %343 = tpu.matmul %341, %342, %cst_100 {dimension_numbers = #tpu.dot_dimension_numbers<[1], [0], [0], [1], [0, 0, 1, 1], [], []>} : vector<8x128xbf16>, vector<128x128xbf16>, vector<8x128xf32> -> vector<8x128xf32>
    %c0_101 = arith.constant 0 : index
    %c0_102 = arith.constant 0 : index
    %344 = vector.load %arg8[%c0_101, %c0_102] : memref<1x128xf32, #tpu.memory_space<vmem>>, vector<1x128xf32>
    %345 = vector.broadcast %344 : vector<1x128xf32> to vector<8x128xf32>
    %346 = arith.addf %343, %345 : vector<8x128xf32>
    %cst_103 = arith.constant dense<0xFF800000> : vector<8xf32>
    %347 = vector.multi_reduction <maximumf>, %346, %cst_103 [1] : vector<8x128xf32> to vector<8xf32>
    %348 = vector.shape_cast %347 : vector<8xf32> to vector<8x1xf32>
    %349 = vector.broadcast %348 : vector<8x1xf32> to vector<8x128xf32>
    %350 = arith.subf %346, %349 : vector<8x128xf32>
    %351 = math.exp %350 : vector<8x128xf32>
    %cst_104 = arith.constant dense<0.000000e+00> : vector<8xf32>
    %352 = vector.multi_reduction <add>, %351, %cst_104 [1] : vector<8x128xf32> to vector<8xf32>
    %353 = vector.shape_cast %352 : vector<8xf32> to vector<8x1xf32>
    %354 = math.log %353 : vector<8x1xf32>
    %355 = arith.addf %354, %348 : vector<8x1xf32>
    %356 = vector.broadcast %355 : vector<8x1xf32> to vector<8x128xf32>
    %357 = arith.subf %346, %356 : vector<8x128xf32>
    %c0_105 = arith.constant 0 : index
    %c0_106 = arith.constant 0 : index
    %358 = vector.load %arg9[%c0_105, %c0_106] : memref<8x128xf32, #tpu.memory_space<vmem>>, vector<8x128xf32>
    tpu.vector_store %arg9[%c0_105, %c0_106], %357 {strides = array<i32>} : memref<8x128xf32, #tpu.memory_space<vmem>>, vector<8x128xf32>,
    return
  }
}

</mosaic_0001>

<bundles_post_ra>
// kernel: tpu_custom_call.1
= control target key start
LH: loop header
LB: loop body
LE: loop exit
PB: predicated region body
PF: predicated region fallthrough
CT: control target
= control target key end

     0   :  { %16 = vsyncpa [#allocation8], 0  ;;  %s2941_s0 = inlined_call_operand.hbm [shape: s32[8], index: 0, kind: input, shape index: {}]   ;;  %s2942_s1 = inlined_call_operand.vmem [shape: f32[1,128], index: 1, kind: input, shape index: {}]   ;;  %s2943_s2 = inlined_call_operand.hbm [shape: f32[128,128], index: 2, kind: input, shape index: {}]   ;;  %s2944_s3 = inlined_call_operand.hbm [shape: bf16[128,384], index: 3, kind: input, shape index: {}]   ;;  %s2945_s4 = inlined_call_operand.hbm [shape: bf16[128,384], index: 4, kind: input, shape index: {}]   ;;  %s2946_s5 = inlined_call_operand.vmem [shape: f32[1,384], index: 5, kind: input, shape index: {}]   ;;  %s2947_s6 = inlined_call_operand.vmem [shape: f32[1,384], index: 6, kind: input, shape index: {}]   ;;  %s2948_s7 = inlined_call_operand.hbm [shape: bf16[128,128], index: 7, kind: input, shape index: {}]   ;;  %s2949_s8 = inlined_call_operand.vmem [shape: f32[1,128], index: 8, kind: input, shape index: {}]   ;;  %s2950_s9 = inlined_call_operand.hbm [shape: f32[8,128], index: 9, kind: output, shape index: {0}]   ;;  %s2951_s10 = inlined_call_operand.hbm [shape: f32[1,128], index: 10, kind: output, shape index: {1}]  }
   0x1   :  { %17 = vsyncpa [#allocation6], 0 }
   0x2   :  { %18 = vsyncpa [#allocation11], 0 }
   0x3   :  { %19 = vsyncpa [#allocation14], 0 }
   0x4   :  { %20 = vsyncpa [#allocation7], 0 }
   0x5   :  { %21 = vsyncpa [#allocation17], 0  ;;  %s2357_s13 = smov [#allocation10]   ;;  %s2203_s17 = scalar_lea.hbm %s2944_s3, 3072 }
   0x6   :  { %s49_s14 = sshll.u32 %s2357_s13, 4  ;;  %p2204_p0 = scmp.ne.s32.totalorder %s2944_s3, %s2203_s17  ;;  %s50_s14 = int_to_ptr.vmem [resolvable:$true] %s49_s14 }
   0x7   :  { %p2207_p1 = scmp.lt.u32.totalorder %s2203_s17, %s2944_s3 }
   0x9   :  { %p2209_p2 = pnand %p2207_p1, %p2204_p0 }
   0xb   :  { %2212 = shalt.err (!%p2209_p2)
}
   0xc   :  { %s2213_s22 = scalar_lea.vmem %s50_s14, 3072  ;;  %p2218_p4 = scmp.lt.s32.totalorder %s50_s14, %s50_s14 }
   0xd   :  { %p2214_p3 = scmp.ne.s32.totalorder %s50_s14, %s2213_s22  ;;  %p2219_p5 = scmp.lt.s32.totalorder %s2213_s22, %s2213_s22 }
   0xf   :  { %p2220_p6 = por %p2219_p5, %p2218_p4 }
  0x11   :  { %p2221_p7 = pnand %p2220_p6, %p2214_p3 }
  0x13   :  { %2224 = shalt.err (!%p2221_p7)
}
  0x14   :  { %s2358_s23 = smov 192   ;;  %s2359_s24 = smov 12  }
  0x15   :  { %55 = dma.hbm_to_vmem [thread:$0]  %s2944_s3, 3072, %s50_s14, [#allocation11], %s2358_s23, %s2358_s23, %s2359_s24  }
  0x16   :  { %s2225_s29 = scalar_lea.hbm %s2941_s0, 16 }
  0x17   :  { %p2226_p8 = scmp.ne.s32.totalorder %s2941_s0, %s2225_s29  ;;  %p2229_p9 = scmp.lt.u32.totalorder %s2225_s29, %s2941_s0 }
  0x19   :  { %p2231_p10 = pnand %p2229_p9, %p2226_p8 }
  0x1b   :  { %2234 = shalt.err (!%p2231_p10)
}
  0x1c   :  { %s2360_s15 = smov [#allocation5]   ;;  %s2361_s3 = smov [#allocation9]  }
  0x1d   :  { %29 = dma.hbm_to_smem %s2941_s0, 16, %s2360_s15, [#allocation8]  }
  0x1e   :  { %s37_s14 = sshll.u32 %s2361_s3, 4  ;;  %s2235_s20 = scalar_lea.hbm %s2943_s2, 2048  ;;  %s38_s14 = int_to_ptr.vmem [resolvable:$true] %s37_s14 }
  0x1f   :  { %p2236_p11 = scmp.ne.s32.totalorder %s2943_s2, %s2235_s20  ;;  %p2239_p12 = scmp.lt.u32.totalorder %s2235_s20, %s2943_s2 }
  0x21   :  { %p2241_p13 = pnand %p2239_p12, %p2236_p11 }
  0x23   :  { %2244 = shalt.err (!%p2241_p13)
}
  0x24   :  { %s2245_s27 = scalar_lea.vmem %s38_s14, 2048  ;;  %p2250_p1 = scmp.lt.s32.totalorder %s38_s14, %s38_s14 }
  0x25   :  { %p2246_p0 = scmp.ne.s32.totalorder %s38_s14, %s2245_s27  ;;  %p2251_p2 = scmp.lt.s32.totalorder %s2245_s27, %s2245_s27 }
  0x27   :  { %p2252_p3 = por %p2251_p2, %p2250_p1 }
  0x29   :  { %p2253_p4 = pnand %p2252_p3, %p2246_p0 }
  0x2b   :  { %2256 = shalt.err (!%p2253_p4)
}
  0x2c   :  { %s2362_s0 = smov 128   ;;  %s2363_s28 = smov 8  }
  0x2d   :  { %43 = dma.hbm_to_vmem [thread:$0]  %s2943_s2, 2048, %s38_s14, [#allocation6], %s2362_s0, %s2362_s0, %s2363_s28  }
  0x2e   :  { %s2364_s11 = smov [#allocation12]   ;;  %s2365_s13 = smov [#allocation13]  }
  0x2f   :  { %s61_s12 = sshll.u32 %s2364_s11, 4  ;;  %s77_s15 = sshll.u32 %s2365_s13, 4  ;;  %s62_s12 = int_to_ptr.vmem [resolvable:$true] %s61_s12  ;;  %s78_s15 = int_to_ptr.vmem [resolvable:$true] %s77_s15 }
  0x30   :  { %s2257_s3 = scalar_lea.hbm %s2945_s4, 3072 }
  0x31   :  { %p2258_p5 = scmp.ne.s32.totalorder %s2945_s4, %s2257_s3  ;;  %p2261_p6 = scmp.lt.u32.totalorder %s2257_s3, %s2945_s4 }
  0x33   :  { %p2263_p7 = pnand %p2261_p6, %p2258_p5 }
  0x35   :  { %2266 = shalt.err (!%p2263_p7)
}
  0x36   :  { %s2267_s2 = scalar_lea.vmem %s62_s12, 3072  ;;  %p2272_p9 = scmp.lt.s32.totalorder %s62_s12, %s62_s12 }
  0x37   :  { %p2268_p8 = scmp.ne.s32.totalorder %s62_s12, %s2267_s2  ;;  %p2273_p10 = scmp.lt.s32.totalorder %s2267_s2, %s2267_s2 }
  0x39   :  { %p2274_p11 = por %p2273_p10, %p2272_p9 }
  0x3b   :  { %p2275_p12 = pnand %p2274_p11, %p2268_p8 }
  0x3d   :  { %2278 = shalt.err (!%p2275_p12)
}
  0x3e   :  { %67 = dma.hbm_to_vmem [thread:$0]  %s2945_s4, 3072, %s62_s12, [#allocation11], %s2358_s23, %s2358_s23, %s2359_s24  }
  0x3f   :  { %s2279_s27 = scalar_lea.hbm %s2948_s7, 1024 }
  0x40   :  { %p2280_p13 = scmp.ne.s32.totalorder %s2948_s7, %s2279_s27  ;;  %p2283_p0 = scmp.lt.u32.totalorder %s2279_s27, %s2948_s7 }
  0x42   :  { %p2285_p1 = pnand %p2283_p0, %p2280_p13 }
  0x44   :  { %2288 = shalt.err (!%p2285_p1)
}
  0x45   :  { %s2289_s11 = scalar_lea.vmem %s78_s15, 1024  ;;  %p2294_p3 = scmp.lt.s32.totalorder %s78_s15, %s78_s15 }
  0x46   :  { %p2290_p2 = scmp.ne.s32.totalorder %s78_s15, %s2289_s11  ;;  %p2295_p4 = scmp.lt.s32.totalorder %s2289_s11, %s2289_s11 }
  0x48   :  { %p2296_p5 = por %p2295_p4, %p2294_p3 }
  0x4a   :  { %p2297_p6 = pnand %p2296_p5, %p2290_p2 }
  0x4c   :  { %2300 = shalt.err (!%p2297_p6)
}
  0x4d   :  { %s2366_s4 = smov 64   ;;  %s2367_s23 = smov 4  }
  0x4e   :  { %83 = dma.hbm_to_vmem [thread:$0]  %s2948_s7, 1024, %s78_s15, [#allocation14], %s2366_s4, %s2366_s4, %s2367_s23  }
  0x4f   :  { %2345 = dma.done.wait [#allocation8], 16  }
  0x50   :  { %2346 = vsyncadd [#allocation8], 4294967280 }
  0x51   :  { %2347 = dma.done.wait [#allocation6], 2048  }
  0x52   :  { %2348 = vsyncadd [#allocation6], 4294965248 }
  0x53   :  { %2349 = dma.done.wait [#allocation11], 6144  }
  0x54   :  { %2350 = vsyncadd [#allocation11], 4294961152 }
  0x55   :  { %2351 = dma.done.wait [#allocation14], 1024  }
  0x56   :  { %2352 = vsyncadd [#allocation14], 4294966272 }
  0x57   :  { %101 = sfence }
  0x58   :  { %v2023_v0 = vld [vmem:[#allocation10 + $0x4] ss:$12 sps:$4 sm:$0xff]   ;;  %v2025_v1 = vld [vmem:[#allocation10] ss:$12 sps:$4 sm:$0xff]   ;;  %v2368_v2 = vmov 0.0   ;;  %v2369_v3 = vmov 0  }
  0x59   :  { %1807 = vmatprep.subr.bf16.mxu1 %v2368_v2  ;;  %354 = vmatprep.mubr.bf16.mxu0 %v2369_v3  ;;  %v2026_v4 = vld [vmem:[#allocation10 + $0x8] ss:$12 sps:$4 sm:$0xff]   ;;  %s2496_s7 = sld [smem:[#allocation5]]  ;;  %v2029_v6 = vld [vmem:[#allocation10 + $0x18] ss:$12 sps:$4 sm:$0xff]   ;;  %vm2370_vm0 = vmmov 0  }
  0x5a   :  { %322 = vmatprep.subr.bf16.mxu0 %v2023_v0  ;;  %v2027_v5 = vld [vmem:[#allocation10 + $0x1c] ss:$12 sps:$4 sm:$0xff]   ;;  %1808 = vmatpush3.bf16.msra.mxu1 %v2026_v4  ;;  %v2030_v7 = vld [vmem:[#allocation10 + $0x20] ss:$12 sps:$4 sm:$0xff]   ;;  %v2034_v10 = vld [vmem:[#allocation10 + $0x38] ss:$12 sps:$4 sm:$0xff]  }
  0x5b   :  { %323 = vmatpush1.bf16.msra.mxu0 %v2025_v1  ;;  %1809 = vmatprep.subr.bf16.mxu1 %v2368_v2  ;;  %v2031_v8 = vld [vmem:[#allocation10 + $0x34] ss:$12 sps:$4 sm:$0xff]   ;;  %v2033_v9 = vld [vmem:[#allocation10 + $0x30] ss:$12 sps:$4 sm:$0xff]   ;;  %v2035_v11 = vld [vmem:[#allocation10 + $0x4c] ss:$12 sps:$4 sm:$0xff]  }
  0x5c   :  { %324 = vmatprep.subr.bf16.mxu0 %v2027_v5  ;;  %1823 = vmatprep.mubr.msk.bf16.mxu1 %vm2370_vm0, %v2368_v2  ;;  %s1637_s13 = sld [smem:[#allocation5 + $0x1]]  ;;  %v2037_v12 = vld [vmem:[#allocation10 + $0x48] ss:$12 sps:$4 sm:$0xff]   ;;  %v2038_v13 = vld [vmem:[#allocation10 + $0x50] ss:$12 sps:$4 sm:$0xff]   ;;  %s1638_s15 = sld [smem:[#allocation5 + $0x2]] }
  0x5d   :  { %v2039_v14 = vld [vmem:[#allocation10 + $0x64] ss:$12 sps:$4 sm:$0xff]   ;;  %v2041_v15 = vld [vmem:[#allocation10 + $0x60] ss:$12 sps:$4 sm:$0xff]   ;;  %v2042_v16 = vld [vmem:[#allocation10 + $0x68] ss:$12 sps:$4 sm:$0xff]  }
  0x5e   :  { %1810 = vmatpush3.bf16.msra.mxu1 %v2030_v7  ;;  %v2043_v17 = vld [vmem:[#allocation10 + $0x7c] ss:$12 sps:$4 sm:$0xff]   ;;  %v2045_v18 = vld [vmem:[#allocation10 + $0x78] ss:$12 sps:$4 sm:$0xff]   ;;  %v2046_v19 = vld [vmem:[#allocation10 + $0x80] ss:$12 sps:$4 sm:$0xff]  }
  0x5f   :  { %325 = vmatpush1.bf16.msra.mxu0 %v2029_v6  ;;  %1811 = vmatprep.subr.bf16.mxu1 %v2368_v2  ;;  %v2047_v20 = vld [vmem:[#allocation10 + $0x94] ss:$12 sps:$4 sm:$0xff]   ;;  %s104_s16 = scalar_lea.vmem [#allocation9], %s2496_s7  ;;  %s1639_s3 = sld [smem:[#allocation5 + $0x3]]  ;;  %v2049_v25 = vld [vmem:[#allocation10 + $0x90] ss:$12 sps:$4 sm:$0xff]  }
  0x60   :  { %326 = vmatprep.subr.bf16.mxu0 %v2031_v8  ;;  %v105_v21 = vld [vmem:[%s104_s16] sm:$0x1]  ;;  %s1640_s18 = sld [smem:[#allocation5 + $0x4]]  ;;  %s1641_s19 = sld [smem:[#allocation5 + $0x5]]  ;;  %v2050_v26 = vld [vmem:[#allocation10 + $0x98] ss:$12 sps:$4 sm:$0xff]   ;;  %v179_v8 = vlaneseq }
  0x61   :  { %v106_v22 = vmax.f32 %v105_v21, 0.0  ;;  %s2506_s20 = sld [smem:[#allocation5 + $0x6]]  ;;  %s2508_s21 = sld [smem:[#allocation5 + $0x7]]  ;;  %v2051_v28 = vld [vmem:[#allocation10 + $0xac] ss:$12 sps:$4 sm:$0xff]  }
  0x62   :  { %1812 = vmatpush3.bf16.msra.mxu1 %v2034_v10  ;;  %s109_s17 = scalar_lea.vmem [#allocation9], %s1637_s13  ;;  %s114_s2 = scalar_lea.vmem [#allocation9], %s1638_s15  ;;  %v2053_v30 = vld [vmem:[#allocation10 + $0xa8] ss:$12 sps:$4 sm:$0xff]   ;;  %v2054_v31 = vld [vmem:[#allocation10 + $0xb0] ss:$12 sps:$4 sm:$0xff]  }
  0x63   :  { %327 = vmatpush1.bf16.msra.mxu0 %v2033_v9  ;;  %1813 = vmatprep.subr.bf16.mxu1 %v2368_v2  ;;  %v110_v23 = vld [vmem:[%s109_s17] sm:$0x1]  ;;  %107 = vst [vmem:[#allocation2] sm:$0x1] %v106_v22  ;;  %v2511_v33 = vld [vmem:[#allocation12 + $0x4] ss:$12 sps:$4 sm:$0xff]  }
  0x64   :  { %328 = vmatprep.subr.bf16.mxu0 %v2035_v11  ;;  %v111_v24 = vmax.f32 %v110_v23, 0.0  ;;  %v115_v27 = vld [vmem:[%s114_s2] sm:$0x1]  ;;  %v2518_v43 = vld [vmem:[#allocation12] ss:$12 sps:$4 sm:$0xff]   ;;  %v180_v9 = vshrl.u32 %v179_v8, 7 }
  0x65   :  { %v116_v29 = vmax.f32 %v115_v27, 0.0  ;;  %s119_s14 = scalar_lea.vmem [#allocation9], %s1639_s3  ;;  %v2520_v44 = vld [vmem:[#allocation12 + $0x8] ss:$12 sps:$4 sm:$0xff]   ;;  %v2524_v48 = vld [vmem:[#allocation12 + $0x18] ss:$12 sps:$4 sm:$0xff]  }
  0x66   :  { %1814 = vmatpush3.bf16.msra.mxu1 %v2038_v13  ;;  %112 = vst [vmem:[#allocation2 + $0x1] sm:$0x1] %v111_v24  ;;  %v120_v32 = vld [vmem:[%s119_s14] sm:$0x1]  ;;  %s124_s22 = scalar_lea.vmem [#allocation9], %s1640_s18  ;;  %s129_s25 = scalar_lea.vmem [#allocation9], %s1641_s19 }
  0x67   :  { %329 = vmatpush1.bf16.msra.mxu0 %v2037_v12  ;;  %1815 = vmatprep.subr.bf16.mxu1 %v2368_v2  ;;  %117 = vst [vmem:[#allocation2 + $0x2] sm:$0x1] %v116_v29  ;;  %v121_v34 = vmax.f32 %v120_v32, 0.0  ;;  %v125_v35 = vld [vmem:[%s124_s22] sm:$0x1]  ;;  %s134_s26 = scalar_lea.vmem [#allocation9], %s2506_s20 }
  0x68   :  { %330 = vmatprep.subr.bf16.mxu0 %v2039_v14  ;;  %v130_v36 = vld [vmem:[%s129_s25] sm:$0x1]  ;;  %v126_v37 = vmax.f32 %v125_v35, 0.0  ;;  %s139_s27 = scalar_lea.vmem [#allocation9], %s2508_s21  ;;  %v2527_v49 = vld [vmem:[#allocation12 + $0x34] ss:$12 sps:$4 sm:$0xff]  }
  0x69   :  { %v131_v38 = vmax.f32 %v130_v36, 0.0  ;;  %v135_v39 = vld [vmem:[%s134_s26] sm:$0x1]  ;;  %122 = vst [vmem:[#allocation2 + $0x3] sm:$0x1] %v121_v34  ;;  %v181_v10 = vsub.s32 0, %v180_v9 }
  0x6a   :  { %1816 = vmatpush3.bf16.msra.mxu1 %v2042_v16  ;;  %v136_v40 = vmax.f32 %v135_v39, 0.0  ;;  %v140_v41 = vld [vmem:[%s139_s27] sm:$0x1]  ;;  %127 = vst [vmem:[#allocation2 + $0x4] sm:$0x1] %v126_v37  ;;  %v189_v11 = vsub.s32 2, %v180_v9 }
  0x6b   :  { %331 = vmatpush1.bf16.msra.mxu0 %v2041_v15  ;;  %1817 = vmatprep.subr.bf16.mxu1 %v2368_v2  ;;  %132 = vst [vmem:[#allocation2 + $0x5] sm:$0x1] %v131_v38  ;;  %v141_v42 = vmax.f32 %v140_v41, 0.0  ;;  %v2522_v47 = vld [vmem:[#allocation12 + $0x1c] ss:$12 sps:$4 sm:$0xff]   ;;  %v185_v13 = vsub.s32 1, %v180_v9 }
  0x6c   :  { %332 = vmatprep.subr.bf16.mxu0 %v2043_v17  ;;  %137 = vst [vmem:[#allocation2 + $0x6] sm:$0x1] %v136_v40  ;;  %v2530_v50 = vld [vmem:[#allocation12 + $0x20] ss:$12 sps:$4 sm:$0xff]   ;;  %v2534_v51 = vld [vmem:[#allocation12 + $0x30] ss:$12 sps:$4 sm:$0xff]  }
  0x6d   :  { %142 = vst [vmem:[#allocation2 + $0x7] sm:$0x1] %v141_v42  ;;  %v2537_v52 = vld [vmem:[#allocation12 + $0x38] ss:$12 sps:$4 sm:$0xff]   ;;  %v2548_v54 = vld [vmem:[#allocation12 + $0x48] ss:$12 sps:$4 sm:$0xff]  }
  0x6e   :  { %1818 = vmatpush3.bf16.msra.mxu1 %v2046_v19  ;;  %v2541_v53 = vld [vmem:[#allocation12 + $0x4c] ss:$12 sps:$4 sm:$0xff]   ;;  %v2551_v55 = vld [vmem:[#allocation12 + $0x50] ss:$12 sps:$4 sm:$0xff]   ;;  %v2561_v58 = vld [vmem:[#allocation12 + $0x68] ss:$12 sps:$4 sm:$0xff]  }
  0x6f   :  { %333 = vmatpush1.bf16.msra.mxu0 %v2045_v18  ;;  %1819 = vmatprep.subr.bf16.mxu1 %v2368_v2  ;;  %v2554_v56 = vld [vmem:[#allocation12 + $0x64] ss:$12 sps:$4 sm:$0xff]   ;;  %v2558_v57 = vld [vmem:[#allocation12 + $0x60] ss:$12 sps:$4 sm:$0xff]   ;;  %v2564_v59 = vld [vmem:[#allocation12 + $0x7c] ss:$12 sps:$4 sm:$0xff]  }
  0x70   :  { %334 = vmatprep.subr.bf16.mxu0 %v2047_v20  ;;  %v2568_v60 = vld [vmem:[#allocation12 + $0x78] ss:$12 sps:$4 sm:$0xff]   ;;  %v2571_v61 = vld [vmem:[#allocation12 + $0x80] ss:$12 sps:$4 sm:$0xff]   ;;  %v2578_v63 = vld [vmem:[#allocation12 + $0x90] ss:$12 sps:$4 sm:$0xff]  }
  0x71   :  { %v2574_v62 = vld [vmem:[#allocation12 + $0x94] ss:$12 sps:$4 sm:$0xff]   ;;  %v2581_v0 = vld [vmem:[#allocation12 + $0x98] ss:$12 sps:$4 sm:$0xff]   ;;  %v2593_v5 = vld [vmem:[%s2942_s1] sm:$0x1] }
  0x72   :  { %1820 = vmatpush3.bf16.msra.mxu1 %v2050_v26  ;;  %v2584_v1 = vld [vmem:[#allocation12 + $0xac] ss:$12 sps:$4 sm:$0xff]   ;;  %v2588_v4 = vld [vmem:[#allocation12 + $0xa8] ss:$12 sps:$4 sm:$0xff]   ;;  %v2596_v6 = vld [vmem:[#allocation12 + $0xb0] ss:$12 sps:$4 sm:$0xff]   ;;  %v440_v7 = vpack.c.bf16 %v2593_v5, %v2593_v5 }
  0x73   :  { %335 = vmatpush1.bf16.msra.mxu0 %v2049_v25  ;;  %1821 = vmatprep.subr.bf16.mxu1 %v2368_v2  ;;  %v177_v12 = vld [vmem:[%s2946_s5] sm:$0x7]  ;;  %s2371_s4 = smov [#allocation16]  }
  0x74   :  { %336 = vmatprep.subr.bf16.mxu0 %v2051_v28  ;;  %v143_v45 = vld [vmem:[#allocation2] sm:$0xff]  ;;  %v182_v14 = vrot.slane %v177_v12, %v181_v10  ;;  %v190_v15 = vrot.slane %v177_v12, %v189_v11  ;;  %v186_v16 = vrot.slane %v177_v12, %v185_v13  ;;  %v438_v28 = vld [vmem:[%s2947_s6] sm:$0x7]  ;;  %s1613_s23 = sshll.u32 %s2371_s4, 4  ;;  %s1614_s23 = int_to_ptr.vmem [resolvable:$true] %s1613_s23 }
  0x75   :  { %v144_v46 = vpack.c.bf16 %v143_v45, %v143_v45  ;;  %v2647_v29 = vrot.slane %v438_v28, %v181_v10  ;;  %s2301_s24 = scalar_lea.vmem %s1614_s23, 16  ;;  %s2305_s12 = scalar_lea.vmem %s1614_s23, 32 }
  0x76   :  { %1822 = vmatpush3.bf16.msra.mxu1 %v2054_v31  ;;  %p2302_p7 = scmp.ne.s32.totalorder %s1614_s23, %s2301_s24  ;;  %p2306_p8 = scmp.lt.s32.totalorder %s1614_s23, %s1614_s23 }
  0x77   :  { %337 = vmatpush1.bf16.msra.mxu0 %v2053_v30  ;;  %1827 = vmatprep.subr.bf16.mxu1 %v2368_v2  ;;  %v2649_v30 = vrot.slane %v438_v28, %v185_v13  ;;  %v2653_v13 = vrot.slane %v438_v28, %v189_v11  ;;  %p2307_p9 = scmp.lt.s32.totalorder %s2305_s12, %s2301_s24 }
  0x78   :  { %585 = vmatprep.subr.bf16.mxu0 %v2511_v33 }
  0x79   :  { %1824 = vmatmul.mubr.bf16.vlgmr.msra.gmra.mrb[0].mxu1 %v144_v46  ;;  %p2308_p10 = por %p2307_p9, %p2306_p8 }
  0x7a   :  { %355 = vmatmul.mubr.bf16.vlgmr.msra.gmra.mrb[0].mxu0 %v144_v46  ;;  %1828 = vmatpush3.bf16.msra.mxu1 %v2520_v44 }
  0x7b   :  { %586 = vmatpush1.bf16.msra.mxu0 %v2518_v43  ;;  %1829 = vmatprep.subr.bf16.mxu1 %v2368_v2  ;;  %p2309_p11 = pnand %p2308_p10, %p2302_p7 }
  0x7c   :  { %587 = vmatprep.subr.bf16.mxu0 %v2522_v47  ;;  %617 = vmatprep.mubr.bf16.mxu0 %v2369_v3 }
  0x7d   :  { %1843 = vmatprep.mubr.msk.bf16.mxu1 %vm2370_vm0, %v2368_v2 }
  0x7e   :  { %1830 = vmatpush3.bf16.msra.mxu1 %v2530_v50 }
  0x7f   :  { %588 = vmatpush1.bf16.msra.mxu0 %v2524_v48  ;;  %1831 = vmatprep.subr.bf16.mxu1 %v2368_v2 }
  0x80   :  { %589 = vmatprep.subr.bf16.mxu0 %v2527_v49 }
  0x82   :  { %1832 = vmatpush3.bf16.msra.mxu1 %v2537_v52 }
  0x83   :  { %590 = vmatpush1.bf16.msra.mxu0 %v2534_v51  ;;  %1833 = vmatprep.subr.bf16.mxu1 %v2368_v2 }
  0x84   :  { %591 = vmatprep.subr.bf16.mxu0 %v2541_v53 }
  0x86   :  { %1834 = vmatpush3.bf16.msra.mxu1 %v2551_v55 }
  0x87   :  { %592 = vmatpush1.bf16.msra.mxu0 %v2548_v54  ;;  %1835 = vmatprep.subr.bf16.mxu1 %v2368_v2 }
  0x88   :  { %593 = vmatprep.subr.bf16.mxu0 %v2554_v56 }
  0x8a   :  { %1836 = vmatpush3.bf16.msra.mxu1 %v2561_v58 }
  0x8b   :  { %594 = vmatpush1.bf16.msra.mxu0 %v2558_v57  ;;  %1837 = vmatprep.subr.bf16.mxu1 %v2368_v2 }
  0x8c   :  { %595 = vmatprep.subr.bf16.mxu0 %v2564_v59 }
  0x8e   :  { %1838 = vmatpush3.bf16.msra.mxu1 %v2571_v61 }
  0x8f   :  { %596 = vmatpush1.bf16.msra.mxu0 %v2568_v60  ;;  %1839 = vmatprep.subr.bf16.mxu1 %v2368_v2 }
  0x90   :  { %597 = vmatprep.subr.bf16.mxu0 %v2574_v62 }
  0x92   :  { %1840 = vmatpush3.bf16.msra.mxu1 %v2581_v0 }
  0x93   :  { %598 = vmatpush1.bf16.msra.mxu0 %v2578_v63  ;;  %1841 = vmatprep.subr.bf16.mxu1 %v2368_v2 }
  0x94   :  { %599 = vmatprep.subr.bf16.mxu0 %v2584_v1 }
  0x96   :  { %1842 = vmatpush3.bf16.msra.mxu1 %v2596_v6 }
  0x97   :  { %600 = vmatpush1.bf16.msra.mxu0 %v2588_v4  ;;  %1847 = vmatprep.subr.bf16.mxu1 %v2368_v2 }
  0x98   :  { %695 = vmatprep.subr.bf16.mxu0 %v2511_v33 }
  0x99   :  { %1844 = vmatmul.mubr.bf16.vlgmr.msra.gmra.mrb[4].mxu1 %v440_v7 }
  0x9a   :  { %618 = vmatmul.mubr.bf16.vlgmr.msra.gmra.mrb[4].mxu0 %v440_v7  ;;  %1848 = vmatpush3.bf16.msra.mxu1 %v2520_v44 }
  0x9b   :  { %696 = vmatpush1.bf16.msra.mxu0 %v2518_v43  ;;  %1849 = vmatprep.subr.bf16.mxu1 %v2368_v2 }
  0x9c   :  { %697 = vmatprep.subr.bf16.mxu0 %v2522_v47  ;;  %727 = vmatprep.mubr.bf16.mxu0 %v2369_v3 }
  0x9d   :  { %1863 = vmatprep.mubr.msk.bf16.mxu1 %vm2370_vm0, %v2368_v2 }
  0x9e   :  { %1850 = vmatpush3.bf16.msra.mxu1 %v2530_v50 }
  0x9f   :  { %698 = vmatpush1.bf16.msra.mxu0 %v2524_v48  ;;  %1851 = vmatprep.subr.bf16.mxu1 %v2368_v2 }
  0xa0   :  { %699 = vmatprep.subr.bf16.mxu0 %v2527_v49 }
  0xa2   :  { %1852 = vmatpush3.bf16.msra.mxu1 %v2537_v52 }
  0xa3   :  { %700 = vmatpush1.bf16.msra.mxu0 %v2534_v51  ;;  %1853 = vmatprep.subr.bf16.mxu1 %v2368_v2 }
  0xa4   :  { %701 = vmatprep.subr.bf16.mxu0 %v2541_v53 }
  0xa6   :  { %1854 = vmatpush3.bf16.msra.mxu1 %v2551_v55 }
  0xa7   :  { %702 = vmatpush1.bf16.msra.mxu0 %v2548_v54  ;;  %1855 = vmatprep.subr.bf16.mxu1 %v2368_v2 }
  0xa8   :  { %703 = vmatprep.subr.bf16.mxu0 %v2554_v56 }
  0xaa   :  { %1856 = vmatpush3.bf16.msra.mxu1 %v2561_v58 }
  0xab   :  { %704 = vmatpush1.bf16.msra.mxu0 %v2558_v57  ;;  %1857 = vmatprep.subr.bf16.mxu1 %v2368_v2 }
  0xac   :  { %705 = vmatprep.subr.bf16.mxu0 %v2564_v59 }
  0xae   :  { %1858 = vmatpush3.bf16.msra.mxu1 %v2571_v61 }
  0xaf   :  { %706 = vmatpush1.bf16.msra.mxu0 %v2568_v60  ;;  %1859 = vmatprep.subr.bf16.mxu1 %v2368_v2 }
  0xb0   :  { %707 = vmatprep.subr.bf16.mxu0 %v2574_v62 }
  0xb2   :  { %1860 = vmatpush3.bf16.msra.mxu1 %v2581_v0 }
  0xb3   :  { %708 = vmatpush1.bf16.msra.mxu0 %v2578_v63  ;;  %1861 = vmatprep.subr.bf16.mxu1 %v2368_v2 }
  0xb4   :  { %709 = vmatprep.subr.bf16.mxu0 %v2584_v1 }
  0xb6   :  { %1862 = vmatpush3.bf16.msra.mxu1 %v2596_v6 }
  0xb7   :  { %710 = vmatpush1.bf16.msra.mxu0 %v2588_v4  ;;  %1867 = vmatprep.subr.bf16.mxu1 %v2368_v2 }
  0xb8   :  { %806 = vmatprep.subr.bf16.mxu0 %v2511_v33 }
 0x14c   :  { %v397_v18 = vpop.f32.mrb[0].mxu1 }
 0x14d   :  { %v356_v17 = vpop.f32.mrb[0].mxu0  ;;  %v398_v21 = vadd.f32 %v397_v18, %v190_v15  ;;  %v1825_v22 = vpop.f32.mrb[1].mxu1 }
 0x14e   :  { %v357_v19 = vadd.f32 %v356_v17, %v182_v14  ;;  %v358_v20 = vpop.f32.mrb[1].mxu0  ;;  %v400_v25 = vpop.f32.mrb[2].mxu1 }
 0x14f   :  { %v359_v23 = vadd.f32 %v358_v20, %v186_v16  ;;  %v360_v24 = vpop.f32.mrb[2].mxu0  ;;  %405 = vst [vmem:[#allocation3 + $0x10] sm:$0xff] %v398_v21  ;;  %v1826_v27 = vpop.f32.mrb[3].mxu1 }
 0x150   :  { %403 = vst [vmem:[#allocation3] sm:$0xff] %v357_v19  ;;  %v361_v26 = vpop.f32.mrb[3].mxu0 }
 0x151   :  { %404 = vst [vmem:[#allocation3 + $0x8] sm:$0xff] %v359_v23 }
 0x158   :  { %v666_v35 = vld [vmem:[#allocation3] ss:$8 sm:$0x7] }
 0x159   :  { %v675_v46 = vrot.slane %v666_v35, 1  ;;  %v685_v19 = vrot.slane %v666_v35, 2 }
 0x16c   :  { %v660_v32 = vpop.f32.mrb[4].mxu1 }
 0x16d   :  { %v619_v31 = vpop.f32.mrb[4].mxu0  ;;  %v1845_v37 = vpop.f32.mrb[5].mxu1  ;;  %v661_v16 = vadd.f32 %v660_v32, %v2653_v13 }
 0x16e   :  { %v620_v34 = vadd.f32 %v619_v31, %v2647_v29  ;;  %v621_v36 = vpop.f32.mrb[5].mxu0  ;;  %v663_v40 = vpop.f32.mrb[6].mxu1  ;;  %v777_v31 = vld [vmem:[#allocation3 + $0x1] ss:$8 sm:$0x7] }
 0x16f   :  { %v622_v38 = vadd.f32 %v621_v36, %v2649_v30  ;;  %v623_v39 = vpop.f32.mrb[6].mxu0  ;;  %v1846_v45 = vpop.f32.mrb[7].mxu1 }
 0x170   :  { %v667_v41 = vadd.f32 %v666_v35, %v620_v34  ;;  %v624_v42 = vpop.f32.mrb[7].mxu0 }
 0x171   :  { %v677_v8 = vadd.f32 %v675_v46, %v622_v38 }
 0x172   :  { %v1692_v7 = vmul.f32 -1.442695, %v667_v41  ;;  %v786_v41 = vrot.slane %v777_v31, 1 }
 0x173   :  { %v1693_v9 = vmul.f32 -1.442695, %v677_v8 }
 0x174   :  { %2095 = vpow2.f32 %v1692_v7 }
 0x175   :  { %2097 = vpow2.f32 %v1693_v9 }
 0x17e   :  { %v2096_v10 = vpop.eup %2095 }
 0x17f   :  { %v671_v12 = vadd.f32 1.0, %v2096_v10  ;;  %v2098_v14 = vpop.eup %2097 }
 0x180   :  { %v681_v15 = vadd.f32 1.0, %v2098_v14 }
 0x181   :  { %2099 = vrcp.f32 %v671_v12 }
 0x182   :  { %2101 = vrcp.f32 %v681_v15 }
 0x18b   :  { %v2100_v17 = vpop.eup %2099 }
 0x18c   :  { %v684_v18 = vmul.f32 %v2100_v17, %v661_v16  ;;  %v2102_v21 = vpop.eup %2101  ;;  %v796_v16 = vrot.slane %v777_v31, 2 }
 0x18d   :  { %v689_v22 = vsub.f32 1.0, %v2102_v21  ;;  %v691_v25 = vmul.f32 %v2102_v21, %v2593_v5 }
 0x18e   :  { %v687_v20 = vadd.f32 %v685_v19, %v684_v18 }
 0x190   :  { %2103 = vtanh.f32 %v687_v20 }
 0x19a   :  { %v2104_v23 = vpop.eup %2103 }
 0x19b   :  { %v690_v24 = vmul.f32 %v2104_v23, %v689_v22 }
 0x19d   :  { %v2657_v26 = vadd.f32 %v691_v25, %v690_v24 }
 0x19f   :  { %693 = vst [vmem:[#allocation4] sm:$0x1] %v2657_v26  ;;  %v694_v11 = vpack.c.bf16 %v2657_v26, %v2657_v26 }
 0x1a1   :  { %728 = vmatmul.mubr.bf16.vlgmr.msra.gmra.mrb[8].mxu0 %v694_v11  ;;  %1864 = vmatmul.mubr.bf16.vlgmr.msra.gmra.mrb[8].mxu1 %v694_v11 }
 0x1a2   :  { %807 = vmatpush1.bf16.msra.mxu0 %v2518_v43  ;;  %1868 = vmatpush3.bf16.msra.mxu1 %v2520_v44 }
 0x1a3   :  { %808 = vmatprep.subr.bf16.mxu0 %v2522_v47  ;;  %1869 = vmatprep.subr.bf16.mxu1 %v2368_v2 }
 0x1a4   :  { %838 = vmatprep.mubr.bf16.mxu0 %v2369_v3  ;;  %1883 = vmatprep.mubr.msk.bf16.mxu1 %vm2370_vm0, %v2368_v2 }
 0x1a6   :  { %809 = vmatpush1.bf16.msra.mxu0 %v2524_v48  ;;  %1870 = vmatpush3.bf16.msra.mxu1 %v2530_v50 }
 0x1a7   :  { %810 = vmatprep.subr.bf16.mxu0 %v2527_v49  ;;  %1871 = vmatprep.subr.bf16.mxu1 %v2368_v2 }
 0x1aa   :  { %811 = vmatpush1.bf16.msra.mxu0 %v2534_v51  ;;  %1872 = vmatpush3.bf16.msra.mxu1 %v2537_v52 }
 0x1ab   :  { %812 = vmatprep.subr.bf16.mxu0 %v2541_v53  ;;  %1873 = vmatprep.subr.bf16.mxu1 %v2368_v2 }
 0x1ae   :  { %813 = vmatpush1.bf16.msra.mxu0 %v2548_v54  ;;  %1874 = vmatpush3.bf16.msra.mxu1 %v2551_v55 }
 0x1af   :  { %814 = vmatprep.subr.bf16.mxu0 %v2554_v56  ;;  %1875 = vmatprep.subr.bf16.mxu1 %v2368_v2 }
 0x1b2   :  { %815 = vmatpush1.bf16.msra.mxu0 %v2558_v57  ;;  %1876 = vmatpush3.bf16.msra.mxu1 %v2561_v58 }
 0x1b3   :  { %816 = vmatprep.subr.bf16.mxu0 %v2564_v59  ;;  %1877 = vmatprep.subr.bf16.mxu1 %v2368_v2 }
 0x1b6   :  { %817 = vmatpush1.bf16.msra.mxu0 %v2568_v60  ;;  %1878 = vmatpush3.bf16.msra.mxu1 %v2571_v61 }
 0x1b7   :  { %818 = vmatprep.subr.bf16.mxu0 %v2574_v62  ;;  %1879 = vmatprep.subr.bf16.mxu1 %v2368_v2 }
 0x1ba   :  { %819 = vmatpush1.bf16.msra.mxu0 %v2578_v63  ;;  %1880 = vmatpush3.bf16.msra.mxu1 %v2581_v0 }
 0x1bb   :  { %820 = vmatprep.subr.bf16.mxu0 %v2584_v1  ;;  %1881 = vmatprep.subr.bf16.mxu1 %v2368_v2 }
 0x1be   :  { %821 = vmatpush1.bf16.msra.mxu0 %v2588_v4  ;;  %1882 = vmatpush3.bf16.msra.mxu1 %v2596_v6 }
 0x1bf   :  { %917 = vmatprep.subr.bf16.mxu0 %v2511_v33  ;;  %1887 = vmatprep.subr.bf16.mxu1 %v2368_v2 }
 0x274   :  { %v729_v5 = vpop.f32.mrb[8].mxu0  ;;  %v770_v27 = vpop.f32.mrb[8].mxu1 }
 0x275   :  { %v730_v28 = vadd.f32 %v729_v5, %v2647_v29  ;;  %v731_v32 = vpop.f32.mrb[9].mxu0  ;;  %v1865_v34 = vpop.f32.mrb[9].mxu1  ;;  %v771_v12 = vadd.f32 %v770_v27, %v2653_v13  ;;  %v888_v5 = vld [vmem:[#allocation3 + $0x2] ss:$8 sm:$0x7] }
 0x276   :  { %v732_v35 = vadd.f32 %v731_v32, %v2649_v30  ;;  %v733_v36 = vpop.f32.mrb[10].mxu0  ;;  %v773_v37 = vpop.f32.mrb[10].mxu1 }
 0x277   :  { %v778_v38 = vadd.f32 %v777_v31, %v730_v28  ;;  %v734_v39 = vpop.f32.mrb[11].mxu0  ;;  %v1866_v40 = vpop.f32.mrb[11].mxu1 }
 0x278   :  { %v788_v45 = vadd.f32 %v786_v41, %v732_v35 }
 0x279   :  { %v1694_v42 = vmul.f32 -1.442695, %v778_v38  ;;  %v897_v38 = vrot.slane %v888_v5, 1 }
 0x27a   :  { %v1695_v46 = vmul.f32 -1.442695, %v788_v45 }
 0x27b   :  { %2105 = vpow2.f32 %v1694_v42 }
 0x27c   :  { %2107 = vpow2.f32 %v1695_v46 }
 0x285   :  { %v2106_v7 = vpop.eup %2105 }
 0x286   :  { %v782_v8 = vadd.f32 1.0, %v2106_v7  ;;  %v2108_v9 = vpop.eup %2107 }
 0x287   :  { %v792_v10 = vadd.f32 1.0, %v2108_v9 }
 0x288   :  { %2109 = vrcp.f32 %v782_v8 }
 0x289   :  { %2111 = vrcp.f32 %v792_v10 }
 0x292   :  { %v2110_v14 = vpop.eup %2109 }
 0x293   :  { %v795_v15 = vmul.f32 %v2110_v14, %v771_v12  ;;  %v2112_v18 = vpop.eup %2111  ;;  %v907_v12 = vrot.slane %v888_v5, 2 }
 0x294   :  { %v800_v19 = vsub.f32 1.0, %v2112_v18  ;;  %v802_v22 = vmul.f32 %v2112_v18, %v2657_v26 }
 0x295   :  { %v798_v17 = vadd.f32 %v796_v16, %v795_v15 }
 0x297   :  { %2113 = vtanh.f32 %v798_v17 }
 0x2a1   :  { %v2114_v20 = vpop.eup %2113 }
 0x2a2   :  { %v801_v21 = vmul.f32 %v2114_v20, %v800_v19 }
 0x2a4   :  { %v2701_v23 = vadd.f32 %v802_v22, %v801_v21 }
 0x2a6   :  { %804 = vst [vmem:[#allocation4 + $0x1] sm:$0x1] %v2701_v23  ;;  %v805_v24 = vpack.c.bf16 %v2701_v23, %v2701_v23 }
 0x2a8   :  { %839 = vmatmul.mubr.bf16.vlgmr.msra.gmra.mrb[12].mxu0 %v805_v24  ;;  %1884 = vmatmul.mubr.bf16.vlgmr.msra.gmra.mrb[12].mxu1 %v805_v24 }
 0x2a9   :  { %918 = vmatpush1.bf16.msra.mxu0 %v2518_v43  ;;  %1888 = vmatpush3.bf16.msra.mxu1 %v2520_v44 }
 0x2aa   :  { %919 = vmatprep.subr.bf16.mxu0 %v2522_v47  ;;  %1889 = vmatprep.subr.bf16.mxu1 %v2368_v2 }
 0x2ab   :  { %949 = vmatprep.mubr.bf16.mxu0 %v2369_v3  ;;  %1903 = vmatprep.mubr.msk.bf16.mxu1 %vm2370_vm0, %v2368_v2 }
 0x2ad   :  { %920 = vmatpush1.bf16.msra.mxu0 %v2524_v48  ;;  %1890 = vmatpush3.bf16.msra.mxu1 %v2530_v50 }
 0x2ae   :  { %921 = vmatprep.subr.bf16.mxu0 %v2527_v49  ;;  %1891 = vmatprep.subr.bf16.mxu1 %v2368_v2 }
 0x2b1   :  { %922 = vmatpush1.bf16.msra.mxu0 %v2534_v51  ;;  %1892 = vmatpush3.bf16.msra.mxu1 %v2537_v52 }
 0x2b2   :  { %923 = vmatprep.subr.bf16.mxu0 %v2541_v53  ;;  %1893 = vmatprep.subr.bf16.mxu1 %v2368_v2 }
 0x2b5   :  { %924 = vmatpush1.bf16.msra.mxu0 %v2548_v54  ;;  %1894 = vmatpush3.bf16.msra.mxu1 %v2551_v55 }
 0x2b6   :  { %925 = vmatprep.subr.bf16.mxu0 %v2554_v56  ;;  %1895 = vmatprep.subr.bf16.mxu1 %v2368_v2 }
 0x2b9   :  { %926 = vmatpush1.bf16.msra.mxu0 %v2558_v57  ;;  %1896 = vmatpush3.bf16.msra.mxu1 %v2561_v58 }
 0x2ba   :  { %927 = vmatprep.subr.bf16.mxu0 %v2564_v59  ;;  %1897 = vmatprep.subr.bf16.mxu1 %v2368_v2 }
 0x2bd   :  { %928 = vmatpush1.bf16.msra.mxu0 %v2568_v60  ;;  %1898 = vmatpush3.bf16.msra.mxu1 %v2571_v61 }
 0x2be   :  { %929 = vmatprep.subr.bf16.mxu0 %v2574_v62  ;;  %1899 = vmatprep.subr.bf16.mxu1 %v2368_v2 }
 0x2c1   :  { %930 = vmatpush1.bf16.msra.mxu0 %v2578_v63  ;;  %1900 = vmatpush3.bf16.msra.mxu1 %v2581_v0 }
 0x2c2   :  { %931 = vmatprep.subr.bf16.mxu0 %v2584_v1  ;;  %1901 = vmatprep.subr.bf16.mxu1 %v2368_v2 }
 0x2c5   :  { %932 = vmatpush1.bf16.msra.mxu0 %v2588_v4  ;;  %1902 = vmatpush3.bf16.msra.mxu1 %v2596_v6 }
 0x2c6   :  { %1028 = vmatprep.subr.bf16.mxu0 %v2511_v33  ;;  %1907 = vmatprep.subr.bf16.mxu1 %v2368_v2 }
 0x37b   :  { %v840_v25 = vpop.f32.mrb[12].mxu0  ;;  %v881_v26 = vpop.f32.mrb[12].mxu1 }
 0x37c   :  { %v841_v11 = vadd.f32 %v840_v25, %v2647_v29  ;;  %v842_v27 = vpop.f32.mrb[13].mxu0  ;;  %v1885_v28 = vpop.f32.mrb[13].mxu1  ;;  %v882_v8 = vadd.f32 %v881_v26, %v2653_v13  ;;  %v999_v25 = vld [vmem:[#allocation3 + $0x3] ss:$8 sm:$0x7] }
 0x37d   :  { %v843_v31 = vadd.f32 %v842_v27, %v2649_v30  ;;  %v844_v32 = vpop.f32.mrb[14].mxu0  ;;  %v884_v34 = vpop.f32.mrb[14].mxu1 }
 0x37e   :  { %v889_v35 = vadd.f32 %v888_v5, %v841_v11  ;;  %v845_v36 = vpop.f32.mrb[15].mxu0  ;;  %v1886_v37 = vpop.f32.mrb[15].mxu1 }
 0x37f   :  { %v899_v40 = vadd.f32 %v897_v38, %v843_v31 }
 0x380   :  { %v1696_v39 = vmul.f32 -1.442695, %v889_v35  ;;  %v1008_v35 = vrot.slane %v999_v25, 1 }
 0x381   :  { %v1697_v41 = vmul.f32 -1.442695, %v899_v40 }
 0x382   :  { %2115 = vpow2.f32 %v1696_v39 }
 0x383   :  { %2117 = vpow2.f32 %v1697_v41 }
 0x38c   :  { %v2116_v42 = vpop.eup %2115 }
 0x38d   :  { %v893_v45 = vadd.f32 1.0, %v2116_v42  ;;  %v2118_v46 = vpop.eup %2117 }
 0x38e   :  { %v903_v7 = vadd.f32 1.0, %v2118_v46 }
 0x38f   :  { %2119 = vrcp.f32 %v893_v45 }
 0x390   :  { %2121 = vrcp.f32 %v903_v7 }
 0x399   :  { %v2120_v9 = vpop.eup %2119 }
 0x39a   :  { %v906_v10 = vmul.f32 %v2120_v9, %v882_v8  ;;  %v2122_v15 = vpop.eup %2121  ;;  %v1018_v8 = vrot.slane %v999_v25, 2 }
 0x39b   :  { %v911_v16 = vsub.f32 1.0, %v2122_v15  ;;  %v913_v19 = vmul.f32 %v2122_v15, %v2701_v23 }
 0x39c   :  { %v909_v14 = vadd.f32 %v907_v12, %v906_v10 }
 0x39e   :  { %2123 = vtanh.f32 %v909_v14 }
 0x3a8   :  { %v2124_v17 = vpop.eup %2123 }
 0x3a9   :  { %v912_v18 = vmul.f32 %v2124_v17, %v911_v16 }
 0x3ab   :  { %v2745_v20 = vadd.f32 %v913_v19, %v912_v18 }
 0x3ad   :  { %915 = vst [vmem:[#allocation4 + $0x2] sm:$0x1] %v2745_v20  ;;  %v916_v21 = vpack.c.bf16 %v2745_v20, %v2745_v20 }
 0x3af   :  { %950 = vmatmul.mubr.bf16.vlgmr.msra.gmra.mrb[16].mxu0 %v916_v21  ;;  %1904 = vmatmul.mubr.bf16.vlgmr.msra.gmra.mrb[16].mxu1 %v916_v21 }
 0x3b0   :  { %1029 = vmatpush1.bf16.msra.mxu0 %v2518_v43  ;;  %1908 = vmatpush3.bf16.msra.mxu1 %v2520_v44 }
 0x3b1   :  { %1030 = vmatprep.subr.bf16.mxu0 %v2522_v47  ;;  %1909 = vmatprep.subr.bf16.mxu1 %v2368_v2 }
 0x3b2   :  { %1060 = vmatprep.mubr.bf16.mxu0 %v2369_v3  ;;  %1923 = vmatprep.mubr.msk.bf16.mxu1 %vm2370_vm0, %v2368_v2 }
 0x3b4   :  { %1031 = vmatpush1.bf16.msra.mxu0 %v2524_v48  ;;  %1910 = vmatpush3.bf16.msra.mxu1 %v2530_v50 }
 0x3b5   :  { %1032 = vmatprep.subr.bf16.mxu0 %v2527_v49  ;;  %1911 = vmatprep.subr.bf16.mxu1 %v2368_v2 }
 0x3b8   :  { %1033 = vmatpush1.bf16.msra.mxu0 %v2534_v51  ;;  %1912 = vmatpush3.bf16.msra.mxu1 %v2537_v52 }
 0x3b9   :  { %1034 = vmatprep.subr.bf16.mxu0 %v2541_v53  ;;  %1913 = vmatprep.subr.bf16.mxu1 %v2368_v2 }
 0x3bc   :  { %1035 = vmatpush1.bf16.msra.mxu0 %v2548_v54  ;;  %1914 = vmatpush3.bf16.msra.mxu1 %v2551_v55 }
 0x3bd   :  { %1036 = vmatprep.subr.bf16.mxu0 %v2554_v56  ;;  %1915 = vmatprep.subr.bf16.mxu1 %v2368_v2 }
 0x3c0   :  { %1037 = vmatpush1.bf16.msra.mxu0 %v2558_v57  ;;  %1916 = vmatpush3.bf16.msra.mxu1 %v2561_v58 }
 0x3c1   :  { %1038 = vmatprep.subr.bf16.mxu0 %v2564_v59  ;;  %1917 = vmatprep.subr.bf16.mxu1 %v2368_v2 }
 0x3c4   :  { %1039 = vmatpush1.bf16.msra.mxu0 %v2568_v60  ;;  %1918 = vmatpush3.bf16.msra.mxu1 %v2571_v61 }
 0x3c5   :  { %1040 = vmatprep.subr.bf16.mxu0 %v2574_v62  ;;  %1919 = vmatprep.subr.bf16.mxu1 %v2368_v2 }
 0x3c8   :  { %1041 = vmatpush1.bf16.msra.mxu0 %v2578_v63  ;;  %1920 = vmatpush3.bf16.msra.mxu1 %v2581_v0 }
 0x3c9   :  { %1042 = vmatprep.subr.bf16.mxu0 %v2584_v1  ;;  %1921 = vmatprep.subr.bf16.mxu1 %v2368_v2 }
 0x3cc   :  { %1043 = vmatpush1.bf16.msra.mxu0 %v2588_v4  ;;  %1922 = vmatpush3.bf16.msra.mxu1 %v2596_v6 }
 0x3cd   :  { %1139 = vmatprep.subr.bf16.mxu0 %v2511_v33  ;;  %1927 = vmatprep.subr.bf16.mxu1 %v2368_v2 }
 0x482   :  { %v951_v22 = vpop.f32.mrb[16].mxu0  ;;  %v992_v23 = vpop.f32.mrb[16].mxu1 }
 0x483   :  { %v952_v24 = vadd.f32 %v951_v22, %v2647_v29  ;;  %v953_v26 = vpop.f32.mrb[17].mxu0  ;;  %v1905_v11 = vpop.f32.mrb[17].mxu1  ;;  %v993_v45 = vadd.f32 %v992_v23, %v2653_v13  ;;  %v1110_v22 = vld [vmem:[#allocation3 + $0x4] ss:$8 sm:$0x7] }
 0x484   :  { %v954_v5 = vadd.f32 %v953_v26, %v2649_v30  ;;  %v955_v27 = vpop.f32.mrb[18].mxu0  ;;  %v995_v28 = vpop.f32.mrb[18].mxu1 }
 0x485   :  { %v1000_v31 = vadd.f32 %v999_v25, %v952_v24  ;;  %v956_v32 = vpop.f32.mrb[19].mxu0  ;;  %v1906_v34 = vpop.f32.mrb[19].mxu1 }
 0x486   :  { %v1010_v37 = vadd.f32 %v1008_v35, %v954_v5 }
 0x487   :  { %v1698_v36 = vmul.f32 -1.442695, %v1000_v31  ;;  %v1119_v31 = vrot.slane %v1110_v22, 1 }
 0x488   :  { %v1699_v38 = vmul.f32 -1.442695, %v1010_v37 }
 0x489   :  { %2125 = vpow2.f32 %v1698_v36 }
 0x48a   :  { %2127 = vpow2.f32 %v1699_v38 }
 0x493   :  { %v2126_v39 = vpop.eup %2125 }
 0x494   :  { %v1004_v40 = vadd.f32 1.0, %v2126_v39  ;;  %v2128_v41 = vpop.eup %2127 }
 0x495   :  { %v1014_v42 = vadd.f32 1.0, %v2128_v41 }
 0x496   :  { %2129 = vrcp.f32 %v1004_v40 }
 0x497   :  { %2131 = vrcp.f32 %v1014_v42  ;;  %v1129_v42 = vrot.slane %v1110_v22, 2 }
 0x4a0   :  { %v2130_v46 = vpop.eup %2129 }
 0x4a1   :  { %v1017_v7 = vmul.f32 %v2130_v46, %v993_v45  ;;  %v2132_v10 = vpop.eup %2131 }
 0x4a2   :  { %v1022_v12 = vsub.f32 1.0, %v2132_v10  ;;  %v1024_v16 = vmul.f32 %v2132_v10, %v2745_v20 }
 0x4a3   :  { %v1020_v9 = vadd.f32 %v1018_v8, %v1017_v7 }
 0x4a5   :  { %2133 = vtanh.f32 %v1020_v9 }
 0x4af   :  { %v2134_v14 = vpop.eup %2133 }
 0x4b0   :  { %v1023_v15 = vmul.f32 %v2134_v14, %v1022_v12 }
 0x4b2   :  { %v2789_v17 = vadd.f32 %v1024_v16, %v1023_v15 }
 0x4b4   :  { %1026 = vst [vmem:[#allocation4 + $0x3] sm:$0x1] %v2789_v17  ;;  %v1027_v18 = vpack.c.bf16 %v2789_v17, %v2789_v17 }
 0x4b6   :  { %1061 = vmatmul.mubr.bf16.vlgmr.msra.gmra.mrb[20].mxu0 %v1027_v18  ;;  %1924 = vmatmul.mubr.bf16.vlgmr.msra.gmra.mrb[20].mxu1 %v1027_v18 }
 0x4b7   :  { %1140 = vmatpush1.bf16.msra.mxu0 %v2518_v43  ;;  %1928 = vmatpush3.bf16.msra.mxu1 %v2520_v44 }
 0x4b8   :  { %1141 = vmatprep.subr.bf16.mxu0 %v2522_v47  ;;  %1929 = vmatprep.subr.bf16.mxu1 %v2368_v2 }
 0x4b9   :  { %1171 = vmatprep.mubr.bf16.mxu0 %v2369_v3  ;;  %1943 = vmatprep.mubr.msk.bf16.mxu1 %vm2370_vm0, %v2368_v2 }
 0x4bb   :  { %1142 = vmatpush1.bf16.msra.mxu0 %v2524_v48  ;;  %1930 = vmatpush3.bf16.msra.mxu1 %v2530_v50 }
 0x4bc   :  { %1143 = vmatprep.subr.bf16.mxu0 %v2527_v49  ;;  %1931 = vmatprep.subr.bf16.mxu1 %v2368_v2 }
 0x4bf   :  { %1144 = vmatpush1.bf16.msra.mxu0 %v2534_v51  ;;  %1932 = vmatpush3.bf16.msra.mxu1 %v2537_v52 }
 0x4c0   :  { %1145 = vmatprep.subr.bf16.mxu0 %v2541_v53  ;;  %1933 = vmatprep.subr.bf16.mxu1 %v2368_v2 }
 0x4c3   :  { %1146 = vmatpush1.bf16.msra.mxu0 %v2548_v54  ;;  %1934 = vmatpush3.bf16.msra.mxu1 %v2551_v55 }
 0x4c4   :  { %1147 = vmatprep.subr.bf16.mxu0 %v2554_v56  ;;  %1935 = vmatprep.subr.bf16.mxu1 %v2368_v2 }
 0x4c7   :  { %1148 = vmatpush1.bf16.msra.mxu0 %v2558_v57  ;;  %1936 = vmatpush3.bf16.msra.mxu1 %v2561_v58 }
 0x4c8   :  { %1149 = vmatprep.subr.bf16.mxu0 %v2564_v59  ;;  %1937 = vmatprep.subr.bf16.mxu1 %v2368_v2 }
 0x4cb   :  { %1150 = vmatpush1.bf16.msra.mxu0 %v2568_v60  ;;  %1938 = vmatpush3.bf16.msra.mxu1 %v2571_v61 }
 0x4cc   :  { %1151 = vmatprep.subr.bf16.mxu0 %v2574_v62  ;;  %1939 = vmatprep.subr.bf16.mxu1 %v2368_v2 }
 0x4cf   :  { %1152 = vmatpush1.bf16.msra.mxu0 %v2578_v63  ;;  %1940 = vmatpush3.bf16.msra.mxu1 %v2581_v0 }
 0x4d0   :  { %1153 = vmatprep.subr.bf16.mxu0 %v2584_v1  ;;  %1941 = vmatprep.subr.bf16.mxu1 %v2368_v2 }
 0x4d3   :  { %1154 = vmatpush1.bf16.msra.mxu0 %v2588_v4  ;;  %1942 = vmatpush3.bf16.msra.mxu1 %v2596_v6 }
 0x4d4   :  { %1250 = vmatprep.subr.bf16.mxu0 %v2511_v33  ;;  %1947 = vmatprep.subr.bf16.mxu1 %v2368_v2 }
 0x589   :  { %v1062_v19 = vpop.f32.mrb[20].mxu0  ;;  %v1103_v20 = vpop.f32.mrb[20].mxu1 }
 0x58a   :  { %v1063_v21 = vadd.f32 %v1062_v19, %v2647_v29  ;;  %v1064_v23 = vpop.f32.mrb[21].mxu0  ;;  %v1925_v24 = vpop.f32.mrb[21].mxu1  ;;  %v1104_v39 = vadd.f32 %v1103_v20, %v2653_v13 }
 0x58b   :  { %v1065_v25 = vadd.f32 %v1064_v23, %v2649_v30  ;;  %v1066_v26 = vpop.f32.mrb[22].mxu0  ;;  %v1106_v11 = vpop.f32.mrb[22].mxu1 }
 0x58c   :  { %v1111_v5 = vadd.f32 %v1110_v22, %v1063_v21  ;;  %v1067_v27 = vpop.f32.mrb[23].mxu0  ;;  %v1926_v28 = vpop.f32.mrb[23].mxu1  ;;  %v2181_v26 = vld [vmem:[#allocation12 + $0x8] ss:$12 sps:$4 sm:$0xff]  }
 0x58d   :  { %v1121_v34 = vadd.f32 %v1119_v31, %v1065_v25  ;;  %v2180_v25 = vld [vmem:[#allocation12] ss:$12 sps:$4 sm:$0xff]   ;;  %v2182_v11 = vld [vmem:[#allocation12 + $0x1c] ss:$12 sps:$4 sm:$0xff]  }
 0x58e   :  { %v1700_v32 = vmul.f32 -1.442695, %v1111_v5  ;;  %v2183_v5 = vld [vmem:[#allocation12 + $0x18] ss:$12 sps:$4 sm:$0xff]   ;;  %v2184_v27 = vld [vmem:[#allocation12 + $0x20] ss:$12 sps:$4 sm:$0xff]  }
 0x58f   :  { %v1701_v33 = vmul.f32 -1.442695, %v1121_v34  ;;  %v2185_v28 = vld [vmem:[#allocation12 + $0x34] ss:$12 sps:$4 sm:$0xff]   ;;  %v2186_v31 = vld [vmem:[#allocation12 + $0x30] ss:$12 sps:$4 sm:$0xff]  }
 0x590   :  { %2135 = vpow2.f32 %v1700_v32  ;;  %v2187_v32 = vld [vmem:[#allocation12 + $0x38] ss:$12 sps:$4 sm:$0xff]  }
 0x591   :  { %2137 = vpow2.f32 %v1701_v33  ;;  %v2188_v34 = vld [vmem:[#allocation12 + $0x4c] ss:$12 sps:$4 sm:$0xff]   ;;  %v2190_v33 = vld [vmem:[#allocation12 + $0x50] ss:$12 sps:$4 sm:$0xff]  }
 0x59a   :  { %v2136_v35 = vpop.eup %2135 }
 0x59b   :  { %v1115_v36 = vadd.f32 1.0, %v2136_v35  ;;  %v2138_v37 = vpop.eup %2137  ;;  %v2191_v35 = vld [vmem:[#allocation12 + $0x64] ss:$12 sps:$4 sm:$0xff]  }
 0x59c   :  { %v1125_v38 = vadd.f32 1.0, %v2138_v37  ;;  %v2193_v37 = vld [vmem:[#allocation12 + $0x68] ss:$12 sps:$4 sm:$0xff]  }
 0x59d   :  { %2139 = vrcp.f32 %v1115_v36  ;;  %v2192_v36 = vld [vmem:[#allocation12 + $0x60] ss:$12 sps:$4 sm:$0xff]  }
 0x59e   :  { %2141 = vrcp.f32 %v1125_v38  ;;  %v2194_v38 = vld [vmem:[#allocation12 + $0x7c] ss:$12 sps:$4 sm:$0xff]  }
 0x5a7   :  { %v2140_v40 = vpop.eup %2139 }
 0x5a8   :  { %v1128_v41 = vmul.f32 %v2140_v40, %v1104_v39  ;;  %v2142_v46 = vpop.eup %2141  ;;  %v2195_v39 = vld [vmem:[#allocation12 + $0x78] ss:$12 sps:$4 sm:$0xff]   ;;  %v2196_v40 = vld [vmem:[#allocation12 + $0x80] ss:$12 sps:$4 sm:$0xff]  }
 0x5a9   :  { %v1133_v7 = vsub.f32 1.0, %v2142_v46  ;;  %v1135_v10 = vmul.f32 %v2142_v46, %v2789_v17  ;;  %v2200_v46 = vld [vmem:[#allocation12 + $0xac] ss:$12 sps:$4 sm:$0xff]  }
 0x5aa   :  { %v1131_v45 = vadd.f32 %v1129_v42, %v1128_v41  ;;  %v2197_v41 = vld [vmem:[#allocation12 + $0x94] ss:$12 sps:$4 sm:$0xff]   ;;  %v2198_v42 = vld [vmem:[#allocation12 + $0x90] ss:$12 sps:$4 sm:$0xff]  }
 0x5ac   :  { %2143 = vtanh.f32 %v1131_v45  ;;  %v2199_v45 = vld [vmem:[#allocation12 + $0x98] ss:$12 sps:$4 sm:$0xff]  }
 0x5b6   :  { %v2144_v8 = vpop.eup %2143 }
 0x5b7   :  { %v1134_v9 = vmul.f32 %v2144_v8, %v1133_v7  ;;  %v2201_v7 = vld [vmem:[#allocation12 + $0xa8] ss:$12 sps:$4 sm:$0xff]   ;;  %v2202_v8 = vld [vmem:[#allocation12 + $0xb0] ss:$12 sps:$4 sm:$0xff]  }
 0x5b9   :  { %v2833_v12 = vadd.f32 %v1135_v10, %v1134_v9 }
 0x5bb   :  { %1137 = vst [vmem:[#allocation4 + $0x4] sm:$0x1] %v2833_v12  ;;  %v1138_v14 = vpack.c.bf16 %v2833_v12, %v2833_v12 }
 0x5bd   :  { %1172 = vmatmul.mubr.bf16.vlgmr.msra.gmra.mrb[24].mxu0 %v1138_v14  ;;  %1944 = vmatmul.mubr.bf16.vlgmr.msra.gmra.mrb[24].mxu1 %v1138_v14  ;;  %v1332_v14 = vld [vmem:[#allocation3 + $0x6] ss:$8 sm:$0x7] }
 0x5be   :  { %1251 = vmatpush1.bf16.msra.mxu0 %v2518_v43  ;;  %1948 = vmatpush3.bf16.msra.mxu1 %v2520_v44  ;;  %v2179_v43 = vld [vmem:[#allocation12 + $0x4] ss:$12 sps:$4 sm:$0xff]  }
 0x5bf   :  { %1252 = vmatprep.subr.bf16.mxu0 %v2522_v47  ;;  %1949 = vmatprep.subr.bf16.mxu1 %v2368_v2 }
 0x5c0   :  { %1282 = vmatprep.mubr.bf16.mxu0 %v2369_v3  ;;  %1963 = vmatprep.mubr.msk.bf16.mxu1 %vm2370_vm0, %v2368_v2 }
 0x5c2   :  { %1253 = vmatpush1.bf16.msra.mxu0 %v2524_v48  ;;  %1950 = vmatpush3.bf16.msra.mxu1 %v2530_v50 }
 0x5c3   :  { %1254 = vmatprep.subr.bf16.mxu0 %v2527_v49  ;;  %1951 = vmatprep.subr.bf16.mxu1 %v2368_v2  ;;  %v1221_v49 = vld [vmem:[#allocation3 + $0x5] ss:$8 sm:$0x7] }
 0x5c4   :  { %v1240_v16 = vrot.slane %v1221_v49, 2 }
 0x5c6   :  { %1255 = vmatpush1.bf16.msra.mxu0 %v2534_v51  ;;  %1952 = vmatpush3.bf16.msra.mxu1 %v2537_v52 }
 0x5c7   :  { %1256 = vmatprep.subr.bf16.mxu0 %v2541_v53  ;;  %1953 = vmatprep.subr.bf16.mxu1 %v2368_v2 }
 0x5ca   :  { %1257 = vmatpush1.bf16.msra.mxu0 %v2548_v54  ;;  %1954 = vmatpush3.bf16.msra.mxu1 %v2551_v55 }
 0x5cb   :  { %1258 = vmatprep.subr.bf16.mxu0 %v2554_v56  ;;  %1955 = vmatprep.subr.bf16.mxu1 %v2368_v2 }
 0x5ce   :  { %1259 = vmatpush1.bf16.msra.mxu0 %v2558_v57  ;;  %1956 = vmatpush3.bf16.msra.mxu1 %v2561_v58  ;;  %v1230_v58 = vrot.slane %v1221_v49, 1 }
 0x5cf   :  { %1260 = vmatprep.subr.bf16.mxu0 %v2564_v59  ;;  %1957 = vmatprep.subr.bf16.mxu1 %v2368_v2 }
 0x5d2   :  { %1261 = vmatpush1.bf16.msra.mxu0 %v2568_v60  ;;  %1958 = vmatpush3.bf16.msra.mxu1 %v2571_v61 }
 0x5d3   :  { %1262 = vmatprep.subr.bf16.mxu0 %v2574_v62  ;;  %1959 = vmatprep.subr.bf16.mxu1 %v2368_v2 }
 0x5d6   :  { %1263 = vmatpush1.bf16.msra.mxu0 %v2578_v63  ;;  %1960 = vmatpush3.bf16.msra.mxu1 %v2581_v0 }
 0x5d7   :  { %1264 = vmatprep.subr.bf16.mxu0 %v2584_v1  ;;  %1961 = vmatprep.subr.bf16.mxu1 %v2368_v2 }
 0x5da   :  { %1265 = vmatpush1.bf16.msra.mxu0 %v2588_v4  ;;  %1962 = vmatpush3.bf16.msra.mxu1 %v2596_v6 }
 0x5db   :  { %1361 = vmatprep.subr.bf16.mxu0 %v2179_v43  ;;  %1967 = vmatprep.subr.bf16.mxu1 %v2368_v2 }
 0x690   :  { %v1173_v44 = vpop.f32.mrb[24].mxu0  ;;  %v1214_v47 = vpop.f32.mrb[24].mxu1 }
 0x691   :  { %v1174_v48 = vadd.f32 %v1173_v44, %v2647_v29  ;;  %v1175_v50 = vpop.f32.mrb[25].mxu0  ;;  %v1945_v51 = vpop.f32.mrb[25].mxu1  ;;  %v1215_v4 = vadd.f32 %v1214_v47, %v2653_v13 }
 0x692   :  { %v1176_v52 = vadd.f32 %v1175_v50, %v2649_v30  ;;  %v1177_v53 = vpop.f32.mrb[26].mxu0  ;;  %v1217_v54 = vpop.f32.mrb[26].mxu1 }
 0x693   :  { %v1222_v55 = vadd.f32 %v1221_v49, %v1174_v48  ;;  %v1178_v56 = vpop.f32.mrb[27].mxu0  ;;  %v1946_v57 = vpop.f32.mrb[27].mxu1  ;;  %v1341_v53 = vrot.slane %v1332_v14, 1 }
 0x694   :  { %v1232_v60 = vadd.f32 %v1230_v58, %v1176_v52 }
 0x695   :  { %v1702_v59 = vmul.f32 -1.442695, %v1222_v55 }
 0x696   :  { %v1703_v61 = vmul.f32 -1.442695, %v1232_v60 }
 0x697   :  { %2145 = vpow2.f32 %v1702_v59 }
 0x698   :  { %2147 = vpow2.f32 %v1703_v61 }
 0x6a1   :  { %v2146_v62 = vpop.eup %2145 }
 0x6a2   :  { %v1226_v63 = vadd.f32 1.0, %v2146_v62  ;;  %v2148_v0 = vpop.eup %2147 }
 0x6a3   :  { %v1236_v1 = vadd.f32 1.0, %v2148_v0  ;;  %v1351_v0 = vrot.slane %v1332_v14, 2 }
 0x6a4   :  { %2149 = vrcp.f32 %v1226_v63 }
 0x6a5   :  { %2151 = vrcp.f32 %v1236_v1 }
 0x6ae   :  { %v2150_v6 = vpop.eup %2149 }
 0x6af   :  { %v1239_v15 = vmul.f32 %v2150_v6, %v1215_v4  ;;  %v2152_v18 = vpop.eup %2151 }
 0x6b0   :  { %v1244_v19 = vsub.f32 1.0, %v2152_v18  ;;  %v1246_v22 = vmul.f32 %v2152_v18, %v2833_v12 }
 0x6b1   :  { %v1242_v17 = vadd.f32 %v1240_v16, %v1239_v15 }
 0x6b3   :  { %2153 = vtanh.f32 %v1242_v17 }
 0x6bd   :  { %v2154_v20 = vpop.eup %2153 }
 0x6be   :  { %v1245_v21 = vmul.f32 %v2154_v20, %v1244_v19  ;;  %v2087_v20 = vld [vmem:[#allocation13] sm:$0xff]  }
 0x6c0   :  { %v2876_v23 = vadd.f32 %v1246_v22, %v1245_v21  ;;  %v2088_v21 = vld [vmem:[#allocation13 + $0x8] sm:$0xff]   ;;  %v2089_v22 = vld [vmem:[#allocation13 + $0x10] sm:$0xff]  }
 0x6c2   :  { %1248 = vst [vmem:[#allocation4 + $0x5] sm:$0x1] %v2876_v23  ;;  %v1249_v24 = vpack.c.bf16 %v2876_v23, %v2876_v23 }
 0x6c4   :  { %1283 = vmatmul.mubr.bf16.vlgmr.msra.gmra.mrb[28].mxu0 %v1249_v24  ;;  %1964 = vmatmul.mubr.bf16.vlgmr.msra.gmra.mrb[28].mxu1 %v1249_v24  ;;  %v2091_v24 = vld [vmem:[#allocation13 + $0x20] sm:$0xff]  }
 0x6c5   :  { %1362 = vmatpush1.bf16.msra.mxu0 %v2180_v25  ;;  %1968 = vmatpush3.bf16.msra.mxu1 %v2181_v26  ;;  %v2092_v25 = vld [vmem:[#allocation13 + $0x28] sm:$0xff]   ;;  %v2093_v26 = vld [vmem:[#allocation13 + $0x30] sm:$0xff]  }
 0x6c6   :  { %1363 = vmatprep.subr.bf16.mxu0 %v2182_v11  ;;  %1969 = vmatprep.subr.bf16.mxu1 %v2368_v2  ;;  %v2094_v11 = vld [vmem:[#allocation13 + $0x38] sm:$0xff]  }
 0x6c7   :  { %1393 = vmatprep.mubr.bf16.mxu0 %v2369_v3  ;;  %1983 = vmatprep.mubr.msk.bf16.mxu1 %vm2370_vm0, %v2368_v2  ;;  %v2189_v3 = vld [vmem:[#allocation12 + $0x48] ss:$12 sps:$4 sm:$0xff]  }
 0x6c9   :  { %1364 = vmatpush1.bf16.msra.mxu0 %v2183_v5  ;;  %1970 = vmatpush3.bf16.msra.mxu1 %v2184_v27 }
 0x6ca   :  { %1365 = vmatprep.subr.bf16.mxu0 %v2185_v28  ;;  %1971 = vmatprep.subr.bf16.mxu1 %v2368_v2 }
 0x6cd   :  { %1366 = vmatpush1.bf16.msra.mxu0 %v2186_v31  ;;  %1972 = vmatpush3.bf16.msra.mxu1 %v2187_v32  ;;  %v1443_v31 = vld [vmem:[#allocation3 + $0x7] ss:$8 sm:$0x7] }
 0x6ce   :  { %1367 = vmatprep.subr.bf16.mxu0 %v2188_v34  ;;  %1973 = vmatprep.subr.bf16.mxu1 %v2368_v2 }
 0x6d1   :  { %1368 = vmatpush1.bf16.msra.mxu0 %v2189_v3  ;;  %1974 = vmatpush3.bf16.msra.mxu1 %v2190_v33 }
 0x6d2   :  { %1369 = vmatprep.subr.bf16.mxu0 %v2191_v35  ;;  %1975 = vmatprep.subr.bf16.mxu1 %v2368_v2 }
 0x6d5   :  { %1370 = vmatpush1.bf16.msra.mxu0 %v2192_v36  ;;  %1976 = vmatpush3.bf16.msra.mxu1 %v2193_v37 }
 0x6d6   :  { %1371 = vmatprep.subr.bf16.mxu0 %v2194_v38  ;;  %1977 = vmatprep.subr.bf16.mxu1 %v2368_v2 }
 0x6d9   :  { %1372 = vmatpush1.bf16.msra.mxu0 %v2195_v39  ;;  %1978 = vmatpush3.bf16.msra.mxu1 %v2196_v40  ;;  %v1452_v39 = vrot.slane %v1443_v31, 1 }
 0x6da   :  { %1373 = vmatprep.subr.bf16.mxu0 %v2197_v41  ;;  %1979 = vmatprep.subr.bf16.mxu1 %v2368_v2 }
 0x6dd   :  { %1374 = vmatpush1.bf16.msra.mxu0 %v2198_v42  ;;  %1980 = vmatpush3.bf16.msra.mxu1 %v2199_v45 }
 0x6de   :  { %1375 = vmatprep.subr.bf16.mxu0 %v2200_v46  ;;  %1981 = vmatprep.subr.bf16.mxu1 %v2368_v2 }
 0x6e1   :  { %1376 = vmatpush1.bf16.msra.mxu0 %v2201_v7  ;;  %1982 = vmatpush3.bf16.msra.mxu1 %v2202_v8 }
 0x6e2   :  { %1987 = vmatprep.subr.bf16.mxu0 %v2368_v2 }
 0x797   :  { %v1284_v9 = vpop.f32.mrb[28].mxu0  ;;  %v1325_v10 = vpop.f32.mrb[28].mxu1 }
 0x798   :  { %v1285_v12 = vadd.f32 %v1284_v9, %v2647_v29  ;;  %v1286_v43 = vpop.f32.mrb[29].mxu0  ;;  %v1965_v44 = vpop.f32.mrb[29].mxu1  ;;  %v1326_v61 = vadd.f32 %v1325_v10, %v2653_v13  ;;  %v1462_v9 = vrot.slane %v1443_v31, 2 }
 0x799   :  { %v1287_v47 = vadd.f32 %v1286_v43, %v2649_v30  ;;  %v1288_v48 = vpop.f32.mrb[30].mxu0  ;;  %v1328_v49 = vpop.f32.mrb[30].mxu1 }
 0x79a   :  { %v1333_v50 = vadd.f32 %v1332_v14, %v1285_v12  ;;  %v1289_v51 = vpop.f32.mrb[31].mxu0  ;;  %v1966_v52 = vpop.f32.mrb[31].mxu1 }
 0x79b   :  { %v1343_v55 = vadd.f32 %v1341_v53, %v1287_v47 }
 0x79c   :  { %v1704_v54 = vmul.f32 -1.442695, %v1333_v50 }
 0x79d   :  { %v1705_v56 = vmul.f32 -1.442695, %v1343_v55 }
 0x79e   :  { %2155 = vpow2.f32 %v1704_v54 }
 0x79f   :  { %2157 = vpow2.f32 %v1705_v56 }
 0x7a8   :  { %v2156_v57 = vpop.eup %2155 }
 0x7a9   :  { %v1337_v58 = vadd.f32 1.0, %v2156_v57  ;;  %v2158_v59 = vpop.eup %2157 }
 0x7aa   :  { %v1347_v60 = vadd.f32 1.0, %v2158_v59 }
 0x7ab   :  { %2159 = vrcp.f32 %v1337_v58 }
 0x7ac   :  { %2161 = vrcp.f32 %v1347_v60 }
 0x7b5   :  { %v2160_v62 = vpop.eup %2159 }
 0x7b6   :  { %v1350_v63 = vmul.f32 %v2160_v62, %v1326_v61  ;;  %v2162_v4 = vpop.eup %2161 }
 0x7b7   :  { %v1355_v6 = vsub.f32 1.0, %v2162_v4  ;;  %v1357_v17 = vmul.f32 %v2162_v4, %v2876_v23  ;;  %v2090_v23 = vld [vmem:[#allocation13 + $0x18] sm:$0xff]  }
 0x7b8   :  { %v1353_v1 = vadd.f32 %v1351_v0, %v1350_v63 }
 0x7ba   :  { %2163 = vtanh.f32 %v1353_v1 }
 0x7c4   :  { %v2164_v15 = vpop.eup %2163 }
 0x7c5   :  { %v1356_v16 = vmul.f32 %v2164_v15, %v1355_v6 }
 0x7c7   :  { %v2896_v18 = vadd.f32 %v1357_v17, %v1356_v16 }
 0x7c9   :  { %1359 = vst [vmem:[#allocation4 + $0x6] sm:$0x1] %v2896_v18  ;;  %v1360_v19 = vpack.c.bf16 %v2896_v18, %v2896_v18 }
 0x7cb   :  { %1394 = vmatmul.mubr.bf16.vlgmr.msra.gmra.mrb[32].mxu0 %v1360_v19  ;;  %1984 = vmatmul.mubr.bf16.vlgmr.msra.gmra.mrb[32].mxu1 %v1360_v19 }
 0x7cc   :  { %2003 = vmatprep.mubr.msk.bf16.mxu0 %vm2370_vm0, %v2368_v2  ;;  %1988 = vmatpush3.bf16.msra.mxu0 %v2087_v20 }
 0x7cd   :  { %1989 = vmatprep.subr.bf16.mxu0 %v2368_v2 }
 0x7d0   :  { %1990 = vmatpush3.bf16.msra.mxu0 %v2088_v21 }
 0x7d1   :  { %1991 = vmatprep.subr.bf16.mxu0 %v2368_v2 }
 0x7d4   :  { %1992 = vmatpush3.bf16.msra.mxu0 %v2089_v22 }
 0x7d5   :  { %1993 = vmatprep.subr.bf16.mxu0 %v2368_v2 }
 0x7d8   :  { %1994 = vmatpush3.bf16.msra.mxu0 %v2090_v23 }
 0x7d9   :  { %1995 = vmatprep.subr.bf16.mxu0 %v2368_v2 }
 0x7dc   :  { %1996 = vmatpush3.bf16.msra.mxu0 %v2091_v24 }
 0x7dd   :  { %1997 = vmatprep.subr.bf16.mxu0 %v2368_v2 }
 0x7e0   :  { %1998 = vmatpush3.bf16.msra.mxu0 %v2092_v25 }
 0x7e1   :  { %1999 = vmatprep.subr.bf16.mxu0 %v2368_v2 }
 0x7e4   :  { %2000 = vmatpush3.bf16.msra.mxu0 %v2093_v26 }
 0x7e5   :  { %2001 = vmatprep.subr.bf16.mxu0 %v2368_v2 }
 0x7e8   :  { %2002 = vmatpush3.bf16.msra.mxu0 %v2094_v11 }
 0x89e   :  { %v1395_v5 = vpop.f32.mrb[32].mxu0  ;;  %v1436_v27 = vpop.f32.mrb[32].mxu1 }
 0x89f   :  { %v1396_v28 = vadd.f32 %v1395_v5, %v2647_v29  ;;  %v1397_v32 = vpop.f32.mrb[33].mxu0  ;;  %v1985_v34 = vpop.f32.mrb[33].mxu1  ;;  %v1437_v7 = vadd.f32 %v1436_v27, %v2653_v13  ;;  %v1708_v13 = vld [vmem:[%s2949_s8] ss:$0 sm:$0xff] }
 0x8a0   :  { %v1398_v3 = vadd.f32 %v1397_v32, %v2649_v30  ;;  %v1399_v33 = vpop.f32.mrb[34].mxu0  ;;  %v1439_v35 = vpop.f32.mrb[34].mxu1 }
 0x8a1   :  { %v1444_v36 = vadd.f32 %v1443_v31, %v1396_v28  ;;  %v1400_v37 = vpop.f32.mrb[35].mxu0  ;;  %v1986_v38 = vpop.f32.mrb[35].mxu1 }
 0x8a2   :  { %v1454_v41 = vadd.f32 %v1452_v39, %v1398_v3 }
 0x8a3   :  { %v1706_v40 = vmul.f32 -1.442695, %v1444_v36 }
 0x8a4   :  { %v1707_v2 = vmul.f32 -1.442695, %v1454_v41 }
 0x8a5   :  { %2165 = vpow2.f32 %v1706_v40 }
 0x8a6   :  { %2167 = vpow2.f32 %v1707_v2 }
 0x8af   :  { %v2166_v42 = vpop.eup %2165 }
 0x8b0   :  { %v1448_v45 = vadd.f32 1.0, %v2166_v42  ;;  %v2168_v29 = vpop.eup %2167 }
 0x8b1   :  { %v1458_v46 = vadd.f32 1.0, %v2168_v29 }
 0x8b2   :  { %2169 = vrcp.f32 %v1448_v45 }
 0x8b3   :  { %2171 = vrcp.f32 %v1458_v46 }
 0x8bc   :  { %v2170_v8 = vpop.eup %2169 }
 0x8bd   :  { %v1461_v30 = vmul.f32 %v2170_v8, %v1437_v7  ;;  %v2172_v12 = vpop.eup %2171 }
 0x8be   :  { %v1466_v14 = vsub.f32 1.0, %v2172_v12  ;;  %v1468_v47 = vmul.f32 %v2172_v12, %v2896_v18 }
 0x8bf   :  { %v1464_v10 = vadd.f32 %v1462_v9, %v1461_v30 }
 0x8c1   :  { %2173 = vtanh.f32 %v1464_v10 }
 0x8cb   :  { %v2174_v43 = vpop.eup %2173 }
 0x8cc   :  { %v1467_v44 = vmul.f32 %v2174_v43, %v1466_v14 }
 0x8ce   :  { %v1469_v48 = vadd.f32 %v1468_v47, %v1467_v44 }
 0x8d0   :  { %1470 = vst [vmem:[#allocation4 + $0x7] sm:$0x1] %v1469_v48  ;;  %1471 = vst [vmem:[#allocation16] sm:$0x1] %v1469_v48 }
 0x8d7   :  { %v1472_v49 = vld [vmem:[#allocation4] sm:$0xff] }
 0x8d8   :  { %v1473_v50 = vpack.c.bf16 %v1472_v49, %v1472_v49 }
 0x8da   :  { %2004 = vmatmul.mubr.bf16.vlgmr.msra.gmra.mrb[36].mxu0 %v1473_v50 }
 0x9ad   :  { %v1579_v51 = vpop.f32.mrb[36].mxu0 }
 0x9ae   :  { %v1580_v52 = vadd.f32 %v1708_v13, %v1579_v51  ;;  %v2005_v53 = vpop.f32.mrb[37].mxu0 }
 0x9af   :  { %v1582_v54 = vpop.f32.mrb[38].mxu0 }
 0x9b0   :  { %1585 = vmax.xlane.f32.xlu0 %v1580_v52  ;;  %v2006_v55 = vpop.f32.mrb[39].mxu0 }
 0xa3d   :  { %v1586_v56 = vpop.xlane.xlu0 %1585 }
 0xa3e   :  { %v1587_v57 = vsub.f32 %v1580_v52, %v1586_v56 }
 0xa40   :  { %v1588_v58 = vmul.f32 1.442695, %v1587_v57 }
 0xa42   :  { %2175 = vpow2.f32 %v1588_v58 }
 0xa4c   :  { %v2176_v59 = vpop.eup %2175 }
 0xa4d   :  { %1590 = vadd.xlane.f32.xlu0 %v2176_v59 }
 0xa4e   :  { %2312 = shalt.err (!%p2309_p11)
}
 0xa4f   :  { %s2313_s13 = scalar_lea.hbm %s2951_s10, 16 }
 0xa50   :  { %p2314_p12 = scmp.ne.s32.totalorder %s2951_s10, %s2313_s13  ;;  %p2317_p13 = scmp.lt.u32.totalorder %s2313_s13, %s2951_s10 }
 0xa52   :  { %p2319_p0 = pnand %p2317_p13, %p2314_p12 }
 0xa54   :  { %2322 = shalt.err (!%p2319_p0)
}
 0xa55   :  { %1616 = dma.vmem_to_hbm [thread:$0]  %s1614_s23, 16, %s2951_s10, [#allocation17]  }
 0xa56   :  { %s2372_s20 = smov [#allocation15]  }
 0xa57   :  { %s1603_s21 = sshll.u32 %s2372_s20, 4  ;;  %s1604_s21 = int_to_ptr.vmem [resolvable:$true] %s1603_s21 }
 0xa58   :  { %s2323_s2 = scalar_lea.vmem %s1604_s21, 128  ;;  %p2328_p2 = scmp.lt.s32.totalorder %s1604_s21, %s1604_s21 }
 0xa59   :  { %p2324_p1 = scmp.ne.s32.totalorder %s1604_s21, %s2323_s2  ;;  %p2329_p3 = scmp.lt.s32.totalorder %s2323_s2, %s2323_s2 }
 0xa5b   :  { %p2330_p4 = por %p2329_p3, %p2328_p2 }
 0xa5d   :  { %p2331_p5 = pnand %p2330_p4, %p2324_p1 }
 0xada   :  { %v1591_v60 = vpop.xlane.xlu0 %1590 }
 0xadb   :  { %2177 = vlog2.f32 %v1591_v60 }
 0xae5   :  { %v2178_v61 = vpop.eup %2177 }
 0xae6   :  { %v1593_v62 = vmul.f32 0.6931472, %v2178_v61 }
 0xae8   :  { %v1594_v63 = vadd.f32 %v1593_v62, %v1586_v56 }
 0xaea   :  { %v1595_v0 = vsub.f32 %v1580_v52, %v1594_v63 }
 0xaec   :  { %1596 = vst [vmem:[#allocation15] sm:$0xff] %v1595_v0 }
 0xaed   :  { %2334 = shalt.err (!%p2331_p5)
}
 0xaee   :  { %s2335_s10 = scalar_lea.hbm %s2950_s9, 128 }
 0xaef   :  { %p2336_p6 = scmp.ne.s32.totalorder %s2950_s9, %s2335_s10  ;;  %p2339_p7 = scmp.lt.u32.totalorder %s2335_s10, %s2950_s9 }
 0xaf1   :  { %p2341_p8 = pnand %p2339_p7, %p2336_p6 }
 0xaf3   :  { %2344 = shalt.err (!%p2341_p8)
}
 0xaf4   :  { %1606 = dma.vmem_to_hbm [thread:$0]  %s1604_s21, 128, %s2950_s9, [#allocation7]  }
 0xaf5   :  { %2353 = dma.done.wait [#allocation7], 128  }
 0xaf6   :  { %2354 = vsyncadd [#allocation7], 4294967168 }
 0xaf7   :  { %2355 = dma.done.wait [#allocation17], 16  }
 0xaf8   :  { %2356 = vsyncadd [#allocation17], 4294967280 }
 0xaf9   :  { %1623 = vsyncpa [#allocation6], 1 }
 0xafa   :  { %1624 = vsyncpa [#allocation11], 1 }
 0xafb   :  { %1625 = vsyncpa [#allocation14], 1 }
 0xafc   :  { %1626 = vsyncpa [#allocation7], 1 }
 0xafd   :  { %1627 = vsyncpa [#allocation17], 1 }
 0xafe   :  { %1628 = vsyncpa [#allocation8], 1 }

</bundles_post_ra>
